<compile_context>
chip_gen: v7x
topology: tpu7x:2x2x1
jax: 0.10.0
libtpu: 0.0.40
codegen_flags: <defaults>
</compile_context>

<pallas_src>
import math
import numpy as np
import jax
import jax.numpy as jnp
from jax.experimental import pallas as pl
from jax.experimental.pallas import tpu as pltpu


T_IN = 284          # implied input length: fc1 expects 16*3 = 48 features
LANE = 128

# Per conv layer: kernel size, total input channels, output channels, pooled output length.
L1 = dict(k=6, cin=1, cout=4, t_half=70)    # 284 -conv-> 140 -pool-> 70
L2 = dict(k=8, cin=4, cout=8, t_half=16)    # 70  -conv-> 32  -pool-> 16
L3 = dict(k=5, cin=8, cout=16, t_half=3)    # 16  -conv-> 6   -pool-> 3

# ---- slab A row layout (width 128, every block start 8-row aligned) ----
ROW_W1 = 0                        # 6 taps, 8-row stride, each (1, 4)
ROW_W2 = ROW_W1 + 8 * L1["k"]     # 48 : 8 taps, 8-row stride, each (4, 8)
ROW_W3 = ROW_W2 + 8 * L2["k"]     # 112: 5 taps, 8-row stride, each (8, 16)
ROW_B = ROW_W3 + 8 * L3["k"]      # 152: conv biases b1/b2/b3 on rows +0/+1/+2
ROW_FC1 = ROW_B + 8               # 160: 3 blocks, 16-row stride, each (16, 30)
ROW_FC1B = ROW_FC1 + 48           # 208: fc1 bias row
ROW_FC2 = ROW_FC1B + 8            # 216: fc2 weight (30, 30), pre-transposed
ROW_FC2B = ROW_FC2 + 32           # 248: fc2 bias row
ROWS_A = ROW_FC2B + 8             # 256 rows  -> 128 KiB slab

# ---- slab B (width 1024): fc3 weight (30, 900 -> padded 1024) + fc3 bias row ----
FC3_PAD = 1024
ROWS_B = 32


def _sigmoid(x):
    # sigmoid via tanh: keeps the transcendental on the EUP, no VALU divide.
    return 0.5 * jnp.tanh(0.5 * x) + 0.5


# ----------------------------- Fused Pallas kernel -----------------------------

def _net_kernel(x_ref, sa_ref, sb_ref, o_ref, a1_ref, a2_ref):
    """Whole network in one invocation; activations live in vregs / VMEM scratch.

    x_ref : (284, 1) time-major input.
    sa_ref: (256, 128) packed slab (per-tap conv weights, conv biases, permuted/blocked
            fc1 weight, fc1/fc2 biases, fc2 weight).
    sb_ref: (32, 1024) packed slab (fc3 weight transposed + lane-padded, fc3 bias).
    o_ref : (1, 1024) lane-padded fc3 output (cols >= 900 sliced off in the wrapper).
    a1_ref/a2_ref: pooled conv1/conv2 activations (kept in VMEM scratch so the next
            layer's taps are plain sublane-strided ref loads).
    """

    def conv_sig_pool(in_ref, layer, row_w, row_b):
        # Fused conv(stride 2) + sigmoid + maxpool(2): compute the even/odd conv-output
        # phases with stride-4 tap loads, max them, add bias, then sigmoid (monotonic).
        k_sz, cin, cout, t_half = layer["k"], layer["cin"], layer["cout"], layer["t_half"]

        def tap(k):
            w = sa_ref[row_w + 8 * k: row_w + 8 * k + cin, 0:cout]        # (cin, cout)
            t_e = in_ref[pl.ds(k, t_half, stride=4), :]                   # rows 4p + k
            t_o = in_ref[pl.ds(k + 2, t_half, stride=4), :]               # rows 4p + 2 + k
            return (jnp.dot(t_e, w, preferred_element_type=jnp.float32),
                    jnp.dot(t_o, w, preferred_element_type=jnp.float32))

        z_e, z_o = tap(0)
        for k in range(1, k_sz):
            d_e, d_o = tap(k)
            z_e, z_o = z_e + d_e, z_o + d_o
        b = sa_ref[row_b: row_b + 1, 0:cout]                              # (1, cout)
        return _sigmoid(jnp.maximum(z_e, z_o) + b)                        # (t_half, cout)

    # ---- conv1 / conv2 / conv3 (each fused with its sigmoid + pool) ----
    a1_ref[...] = conv_sig_pool(x_ref, L1, ROW_W1, ROW_B + 0)             # (70, 4)
    a2_ref[...] = conv_sig_pool(a1_ref, L2, ROW_W2, ROW_B + 1)            # (16, 8)
    a3 = conv_sig_pool(a2_ref, L3, ROW_W3, ROW_B + 2)                     # (3, 16) value

    # ---- fc1: PyTorch channel-major flatten folded into the weight permutation; the
    # (1,48)x(48,30) matmul becomes 3 accumulated (1,16)x(16,30) matmuls (no lane-concat).
    h = sa_ref[ROW_FC1B: ROW_FC1B + 1, 0:30]                              # (1, 30) bias
    for t in range(3):
        w_t = sa_ref[ROW_FC1 + 16 * t: ROW_FC1 + 16 * t + 16, 0:30]       # (16, 30)
        h = h + jnp.dot(a3[t:t + 1, :], w_t, preferred_element_type=jnp.float32)
    h = _sigmoid(h)                                                       # (1, 30)

    # ---- fc2 ----
    h = _sigmoid(jnp.dot(h, sa_ref[ROW_FC2: ROW_FC2 + 30, 0:30],
                         preferred_element_type=jnp.float32)
                 + sa_ref[ROW_FC2B: ROW_FC2B + 1, 0:30])                  # (1, 30)

    # ---- fc3 (lane-padded to 1024 -> unmasked lane-dense output stores) ----
    o_ref[...] = _sigmoid(jnp.dot(h, sb_ref[0:30, :],
                                  preferred_element_type=jnp.float32)
                          + sb_ref[30:31, :])                             # (1, 1024)


def forward_pallas(x, params):
    """x: (1, 1, 284) NCL float32 -> (30, 30)."""
    x_tc = jnp.reshape(x, (T_IN, 1))                                      # time-major
    out = pl.pallas_call(
        _net_kernel,
        out_shape=jax.ShapeDtypeStruct((1, FC3_PAD), jnp.float32),
        in_specs=[pl.BlockSpec(memory_space=pltpu.MemorySpace.VMEM)] * 3,
        out_specs=pl.BlockSpec(memory_space=pltpu.MemorySpace.VMEM),
        scratch_shapes=[
            pltpu.VMEM((L1["t_half"], L1["cout"]), jnp.float32),          # act1 (70, 4)
            pltpu.VMEM((L2["t_half"], L2["cout"]), jnp.float32),          # act2 (16, 8)
        ],
    )(x_tc, params["slab_a"], params["slab_b"])
    return out[0, :900].reshape(30, 30)


# ----------------------------- Host-side weight packing -----------------------------

def _put_conv_taps(slab, row0, w, groups):
    """PyTorch conv weight (C_out, C_in/groups, K) -> per-tap dense (C_in_total, C_out)
    blocks (block-diagonal over groups), tap k stored at rows [row0+8k, row0+8k+C_in_total)."""
    w = np.asarray(w, np.float32)
    c_out, c_in_g, k_sz = w.shape
    out_per_g = c_out // groups
    for k in range(k_sz):
        for o in range(c_out):
            g = o // out_per_g
            for ci in range(c_in_g):
                slab[row0 + 8 * k + g * c_in_g + ci, o] = w[o, ci, k]


def pack_params(raw):
    sa = np.zeros((ROWS_A, LANE), np.float32)
    _put_conv_taps(sa, ROW_W1, raw["c1_w"], groups=1)
    _put_conv_taps(sa, ROW_W2, raw["c2_w"], groups=2)
    _put_conv_taps(sa, ROW_W3, raw["c3_w"], groups=4)
    sa[ROW_B + 0, 0:4] = np.asarray(raw["c1_b"])
    sa[ROW_B + 1, 0:8] = np.asarray(raw["c2_b"])
    sa[ROW_B + 2, 0:16] = np.asarray(raw["c3_b"])
    # fc1 (30, 48): PyTorch flatten index is c*3 + t -> block t holds the 16 rows for c.
    fc1 = np.asarray(raw["fc1_w"], np.float32)
    for t in range(3):
        for c in range(16):
            sa[ROW_FC1 + 16 * t + c, 0:30] = fc1[:, c * 3 + t]
    sa[ROW_FC1B, 0:30] = np.asarray(raw["fc1_b"])
    sa[ROW_FC2: ROW_FC2 + 30, 0:30] = np.asarray(raw["fc2_w"], np.float32).T
    sa[ROW_FC2B, 0:30] = np.asarray(raw["fc2_b"])

    sb = np.zeros((ROWS_B, FC3_PAD), np.float32)
    sb[0:30, 0:900] = np.asarray(raw["fc3_w"], np.float32).T
    sb[30, 0:900] = np.asarray(raw["fc3_b"])
    return {"slab_a": jnp.asarray(sa), "slab_b": jnp.asarray(sb)}


# ----------------------------- Pure-JAX reference -----------------------------

def forward_ref(x, raw):
    def conv1d(z, w, b, stride, groups):
        y = jax.lax.conv_general_dilated(
            z, w, window_strides=(stride,), padding="VALID",
            dimension_numbers=("NCH", "OIH", "NCH"), feature_group_count=groups)
        return y + b[None, :, None]

    def pool2(z):
        n, c, t = z.shape
        return jnp.max(z[:, :, : (t // 2) * 2].reshape(n, c, t // 2, 2), axis=3)

    sig = lambda z: 1.0 / (1.0 + jnp.exp(-z))
    y = pool2(sig(conv1d(x, raw["c1_w"], raw["c1_b"], 2, 1)))
    y = pool2(sig(conv1d(y, raw["c2_w"], raw["c2_b"], 2, 2)))
    y = pool2(sig(conv1d(y, raw["c3_w"], raw["c3_b"], 2, 4)))
    v = y.flatten()
    h = sig(v @ raw["fc1_w"].T + raw["fc1_b"])
    h = sig(h @ raw["fc2_w"].T + raw["fc2_b"])
    h = sig(h @ raw["fc3_w"].T + raw["fc3_b"])
    return h.reshape(30, 30)


# ----------------------------- Parameter init -----------------------------

def init_params(key):
    def uinit(k, shape, fan_in):
        bound = 1.0 / math.sqrt(fan_in)
        return jax.random.uniform(k, shape, jnp.float32, -bound, bound)

    ks = jax.random.split(key, 12)
    raw = {
        "c1_w": uinit(ks[0], (4, 1, 6), 1 * 6),   "c1_b": uinit(ks[1], (4,), 1 * 6),
        "c2_w": uinit(ks[2], (8, 2, 8), 2 * 8),   "c2_b": uinit(ks[3], (8,), 2 * 8),
        "c3_w": uinit(ks[4], (16, 2, 5), 2 * 5),  "c3_b": uinit(ks[5], (16,), 2 * 5),
        "fc1_w": uinit(ks[6], (30, 48), 48),      "fc1_b": uinit(ks[7], (30,), 48),
        "fc2_w": uinit(ks[8], (30, 30), 30),      "fc2_b": uinit(ks[9], (30,), 30),
        "fc3_w": uinit(ks[10], (900, 30), 30),    "fc3_b": uinit(ks[11], (900,), 30),
    }
    return pack_params(raw), raw


# ----------------------------- Main -----------------------------

if __name__ == "__main__":
    key = jax.random.PRNGKey(0)
    pkey, xkey = jax.random.split(key)
    params, raw = init_params(pkey)

    x = jax.random.normal(xkey, (1, 1, T_IN), dtype=jnp.float32)

    fwd = jax.jit(forward_pallas)
    out = jax.block_until_ready(fwd(x, params))

    ref = jax.block_until_ready(forward_ref(x, raw))
    assert out.shape == (30, 30)
    assert jnp.allclose(out, ref, atol=1e-4, rtol=1e-4), "mismatch vs JAX reference"

    print("KERNEL_OK")
</pallas_src>

<mosaic_0001>
module attributes {stable_mosaic.version = 11 : i64} {
  func.func @_net_kernel(%arg0: memref<284x1xf32, #tpu.memory_space<vmem>>, %arg1: memref<256x128xf32, #tpu.memory_space<vmem>>, %arg2: memref<32x1024xf32, #tpu.memory_space<vmem>>, %arg3: memref<1x1024xf32, #tpu.memory_space<vmem>>, %arg4: memref<70x4xf32, #tpu.memory_space<vmem>>, %arg5: memref<16x8xf32, #tpu.memory_space<vmem>>) attributes {dimension_semantics = [], scalar_prefetch = 0 : i64, scratch_operands = 2 : i64, tpu.core_type = #tpu.core_type<tc>} {
    %c0 = arith.constant 0 : index
    %c0_0 = arith.constant 0 : index
    %0 = vector.load %arg1[%c0, %c0_0] : memref<256x128xf32, #tpu.memory_space<vmem>>, vector<1x4xf32>
    %c0_1 = arith.constant 0 : index
    %c0_2 = arith.constant 0 : index
    %1 = tpu.strided_load %arg0[%c0_1, %c0_2] {strides = array<i32: 4, 1>} : memref<284x1xf32, #tpu.memory_space<vmem>>, vector<70x1xf32>
    %c2 = arith.constant 2 : index
    %c0_3 = arith.constant 0 : index
    %2 = tpu.strided_load %arg0[%c2, %c0_3] {strides = array<i32: 4, 1>} : memref<284x1xf32, #tpu.memory_space<vmem>>, vector<70x1xf32>
    %cst = arith.constant dense<0.000000e+00> : vector<70x4xf32>
    %3 = tpu.matmul %1, %0, %cst {dimension_numbers = #tpu.dot_dimension_numbers<[1], [0], [0], [1], [0, 0, 1, 1], [], []>} : vector<70x1xf32>, vector<1x4xf32>, vector<70x4xf32> -> vector<70x4xf32>
    %cst_4 = arith.constant dense<0.000000e+00> : vector<70x4xf32>
    %4 = tpu.matmul %2, %0, %cst_4 {dimension_numbers = #tpu.dot_dimension_numbers<[1], [0], [0], [1], [0, 0, 1, 1], [], []>} : vector<70x1xf32>, vector<1x4xf32>, vector<70x4xf32> -> vector<70x4xf32>
    %c8 = arith.constant 8 : index
    %c0_5 = arith.constant 0 : index
    %5 = vector.load %arg1[%c8, %c0_5] : memref<256x128xf32, #tpu.memory_space<vmem>>, vector<1x4xf32>
    %c1 = arith.constant 1 : index
    %c0_6 = arith.constant 0 : index
    %6 = tpu.strided_load %arg0[%c1, %c0_6] {strides = array<i32: 4, 1>} : memref<284x1xf32, #tpu.memory_space<vmem>>, vector<70x1xf32>
    %c3 = arith.constant 3 : index
    %c0_7 = arith.constant 0 : index
    %7 = tpu.strided_load %arg0[%c3, %c0_7] {strides = array<i32: 4, 1>} : memref<284x1xf32, #tpu.memory_space<vmem>>, vector<70x1xf32>
    %cst_8 = arith.constant dense<0.000000e+00> : vector<70x4xf32>
    %8 = tpu.matmul %6, %5, %cst_8 {dimension_numbers = #tpu.dot_dimension_numbers<[1], [0], [0], [1], [0, 0, 1, 1], [], []>} : vector<70x1xf32>, vector<1x4xf32>, vector<70x4xf32> -> vector<70x4xf32>
    %cst_9 = arith.constant dense<0.000000e+00> : vector<70x4xf32>
    %9 = tpu.matmul %7, %5, %cst_9 {dimension_numbers = #tpu.dot_dimension_numbers<[1], [0], [0], [1], [0, 0, 1, 1], [], []>} : vector<70x1xf32>, vector<1x4xf32>, vector<70x4xf32> -> vector<70x4xf32>
    %10 = arith.addf %3, %8 : vector<70x4xf32>
    %11 = arith.addf %4, %9 : vector<70x4xf32>
    %c16 = arith.constant 16 : index
    %c0_10 = arith.constant 0 : index
    %12 = vector.load %arg1[%c16, %c0_10] : memref<256x128xf32, #tpu.memory_space<vmem>>, vector<1x4xf32>
    %c2_11 = arith.constant 2 : index
    %c0_12 = arith.constant 0 : index
    %13 = tpu.strided_load %arg0[%c2_11, %c0_12] {strides = array<i32: 4, 1>} : memref<284x1xf32, #tpu.memory_space<vmem>>, vector<70x1xf32>
    %c4 = arith.constant 4 : index
    %c0_13 = arith.constant 0 : index
    %14 = tpu.strided_load %arg0[%c4, %c0_13] {strides = array<i32: 4, 1>} : memref<284x1xf32, #tpu.memory_space<vmem>>, vector<70x1xf32>
    %cst_14 = arith.constant dense<0.000000e+00> : vector<70x4xf32>
    %15 = tpu.matmul %13, %12, %cst_14 {dimension_numbers = #tpu.dot_dimension_numbers<[1], [0], [0], [1], [0, 0, 1, 1], [], []>} : vector<70x1xf32>, vector<1x4xf32>, vector<70x4xf32> -> vector<70x4xf32>
    %cst_15 = arith.constant dense<0.000000e+00> : vector<70x4xf32>
    %16 = tpu.matmul %14, %12, %cst_15 {dimension_numbers = #tpu.dot_dimension_numbers<[1], [0], [0], [1], [0, 0, 1, 1], [], []>} : vector<70x1xf32>, vector<1x4xf32>, vector<70x4xf32> -> vector<70x4xf32>
    %17 = arith.addf %10, %15 : vector<70x4xf32>
    %18 = arith.addf %11, %16 : vector<70x4xf32>
    %c24 = arith.constant 24 : index
    %c0_16 = arith.constant 0 : index
    %19 = vector.load %arg1[%c24, %c0_16] : memref<256x128xf32, #tpu.memory_space<vmem>>, vector<1x4xf32>
    %c3_17 = arith.constant 3 : index
    %c0_18 = arith.constant 0 : index
    %20 = tpu.strided_load %arg0[%c3_17, %c0_18] {strides = array<i32: 4, 1>} : memref<284x1xf32, #tpu.memory_space<vmem>>, vector<70x1xf32>
    %c5 = arith.constant 5 : index
    %c0_19 = arith.constant 0 : index
    %21 = tpu.strided_load %arg0[%c5, %c0_19] {strides = array<i32: 4, 1>} : memref<284x1xf32, #tpu.memory_space<vmem>>, vector<70x1xf32>
    %cst_20 = arith.constant dense<0.000000e+00> : vector<70x4xf32>
    %22 = tpu.matmul %20, %19, %cst_20 {dimension_numbers = #tpu.dot_dimension_numbers<[1], [0], [0], [1], [0, 0, 1, 1], [], []>} : vector<70x1xf32>, vector<1x4xf32>, vector<70x4xf32> -> vector<70x4xf32>
    %cst_21 = arith.constant dense<0.000000e+00> : vector<70x4xf32>
    %23 = tpu.matmul %21, %19, %cst_21 {dimension_numbers = #tpu.dot_dimension_numbers<[1], [0], [0], [1], [0, 0, 1, 1], [], []>} : vector<70x1xf32>, vector<1x4xf32>, vector<70x4xf32> -> vector<70x4xf32>
    %24 = arith.addf %17, %22 : vector<70x4xf32>
    %25 = arith.addf %18, %23 : vector<70x4xf32>
    %c32 = arith.constant 32 : index
    %c0_22 = arith.constant 0 : index
    %26 = vector.load %arg1[%c32, %c0_22] : memref<256x128xf32, #tpu.memory_space<vmem>>, vector<1x4xf32>
    %c4_23 = arith.constant 4 : index
    %c0_24 = arith.constant 0 : index
    %27 = tpu.strided_load %arg0[%c4_23, %c0_24] {strides = array<i32: 4, 1>} : memref<284x1xf32, #tpu.memory_space<vmem>>, vector<70x1xf32>
    %c6 = arith.constant 6 : index
    %c0_25 = arith.constant 0 : index
    %28 = tpu.strided_load %arg0[%c6, %c0_25] {strides = array<i32: 4, 1>} : memref<284x1xf32, #tpu.memory_space<vmem>>, vector<70x1xf32>
    %cst_26 = arith.constant dense<0.000000e+00> : vector<70x4xf32>
    %29 = tpu.matmul %27, %26, %cst_26 {dimension_numbers = #tpu.dot_dimension_numbers<[1], [0], [0], [1], [0, 0, 1, 1], [], []>} : vector<70x1xf32>, vector<1x4xf32>, vector<70x4xf32> -> vector<70x4xf32>
    %cst_27 = arith.constant dense<0.000000e+00> : vector<70x4xf32>
    %30 = tpu.matmul %28, %26, %cst_27 {dimension_numbers = #tpu.dot_dimension_numbers<[1], [0], [0], [1], [0, 0, 1, 1], [], []>} : vector<70x1xf32>, vector<1x4xf32>, vector<70x4xf32> -> vector<70x4xf32>
    %31 = arith.addf %24, %29 : vector<70x4xf32>
    %32 = arith.addf %25, %30 : vector<70x4xf32>
    %c40 = arith.constant 40 : index
    %c0_28 = arith.constant 0 : index
    %33 = vector.load %arg1[%c40, %c0_28] : memref<256x128xf32, #tpu.memory_space<vmem>>, vector<1x4xf32>
    %c5_29 = arith.constant 5 : index
    %c0_30 = arith.constant 0 : index
    %34 = tpu.strided_load %arg0[%c5_29, %c0_30] {strides = array<i32: 4, 1>} : memref<284x1xf32, #tpu.memory_space<vmem>>, vector<70x1xf32>
    %c7 = arith.constant 7 : index
    %c0_31 = arith.constant 0 : index
    %35 = tpu.strided_load %arg0[%c7, %c0_31] {strides = array<i32: 4, 1>} : memref<284x1xf32, #tpu.memory_space<vmem>>, vector<70x1xf32>
    %cst_32 = arith.constant dense<0.000000e+00> : vector<70x4xf32>
    %36 = tpu.matmul %34, %33, %cst_32 {dimension_numbers = #tpu.dot_dimension_numbers<[1], [0], [0], [1], [0, 0, 1, 1], [], []>} : vector<70x1xf32>, vector<1x4xf32>, vector<70x4xf32> -> vector<70x4xf32>
    %cst_33 = arith.constant dense<0.000000e+00> : vector<70x4xf32>
    %37 = tpu.matmul %35, %33, %cst_33 {dimension_numbers = #tpu.dot_dimension_numbers<[1], [0], [0], [1], [0, 0, 1, 1], [], []>} : vector<70x1xf32>, vector<1x4xf32>, vector<70x4xf32> -> vector<70x4xf32>
    %38 = arith.addf %31, %36 : vector<70x4xf32>
    %39 = arith.addf %32, %37 : vector<70x4xf32>
    %c152 = arith.constant 152 : index
    %c0_34 = arith.constant 0 : index
    %40 = vector.load %arg1[%c152, %c0_34] : memref<256x128xf32, #tpu.memory_space<vmem>>, vector<1x4xf32>
    %41 = arith.maximumf %38, %39 : vector<70x4xf32>
    %42 = vector.broadcast %40 : vector<1x4xf32> to vector<70x4xf32>
    %43 = arith.addf %41, %42 : vector<70x4xf32>
    %cst_35 = arith.constant 5.000000e-01 : f32
    %44 = vector.broadcast %cst_35 : f32 to vector<70x4xf32>
    %45 = arith.mulf %44, %43 : vector<70x4xf32>
    %46 = math.tanh %45 : vector<70x4xf32>
    %cst_36 = arith.constant 5.000000e-01 : f32
    %47 = vector.broadcast %cst_36 : f32 to vector<70x4xf32>
    %48 = arith.mulf %47, %46 : vector<70x4xf32>
    %cst_37 = arith.constant 5.000000e-01 : f32
    %49 = vector.broadcast %cst_37 : f32 to vector<70x4xf32>
    %50 = arith.addf %48, %49 : vector<70x4xf32>
    %c0_38 = arith.constant 0 : index
    %c0_39 = arith.constant 0 : index
    %51 = vector.load %arg4[%c0_38, %c0_39] : memref<70x4xf32, #tpu.memory_space<vmem>>, vector<70x4xf32>
    tpu.vector_store %arg4[%c0_38, %c0_39], %50 {strides = array<i32>} : memref<70x4xf32, #tpu.memory_space<vmem>>, vector<70x4xf32>,
    %c48 = arith.constant 48 : index
    %c0_40 = arith.constant 0 : index
    %52 = vector.load %arg1[%c48, %c0_40] : memref<256x128xf32, #tpu.memory_space<vmem>>, vector<4x8xf32>
    %c0_41 = arith.constant 0 : index
    %c0_42 = arith.constant 0 : index
    %53 = tpu.strided_load %arg4[%c0_41, %c0_42] {strides = array<i32: 4, 1>} : memref<70x4xf32, #tpu.memory_space<vmem>>, vector<16x4xf32>
    %c2_43 = arith.constant 2 : index
    %c0_44 = arith.constant 0 : index
    %54 = tpu.strided_load %arg4[%c2_43, %c0_44] {strides = array<i32: 4, 1>} : memref<70x4xf32, #tpu.memory_space<vmem>>, vector<16x4xf32>
    %cst_45 = arith.constant dense<0.000000e+00> : vector<16x8xf32>
    %55 = tpu.matmul %53, %52, %cst_45 {dimension_numbers = #tpu.dot_dimension_numbers<[1], [0], [0], [1], [0, 0, 1, 1], [], []>} : vector<16x4xf32>, vector<4x8xf32>, vector<16x8xf32> -> vector<16x8xf32>
    %cst_46 = arith.constant dense<0.000000e+00> : vector<16x8xf32>
    %56 = tpu.matmul %54, %52, %cst_46 {dimension_numbers = #tpu.dot_dimension_numbers<[1], [0], [0], [1], [0, 0, 1, 1], [], []>} : vector<16x4xf32>, vector<4x8xf32>, vector<16x8xf32> -> vector<16x8xf32>
    %c56 = arith.constant 56 : index
    %c0_47 = arith.constant 0 : index
    %57 = vector.load %arg1[%c56, %c0_47] : memref<256x128xf32, #tpu.memory_space<vmem>>, vector<4x8xf32>
    %c1_48 = arith.constant 1 : index
    %c0_49 = arith.constant 0 : index
    %58 = tpu.strided_load %arg4[%c1_48, %c0_49] {strides = array<i32: 4, 1>} : memref<70x4xf32, #tpu.memory_space<vmem>>, vector<16x4xf32>
    %c3_50 = arith.constant 3 : index
    %c0_51 = arith.constant 0 : index
    %59 = tpu.strided_load %arg4[%c3_50, %c0_51] {strides = array<i32: 4, 1>} : memref<70x4xf32, #tpu.memory_space<vmem>>, vector<16x4xf32>
    %cst_52 = arith.constant dense<0.000000e+00> : vector<16x8xf32>
    %60 = tpu.matmul %58, %57, %cst_52 {dimension_numbers = #tpu.dot_dimension_numbers<[1], [0], [0], [1], [0, 0, 1, 1], [], []>} : vector<16x4xf32>, vector<4x8xf32>, vector<16x8xf32> -> vector<16x8xf32>
    %cst_53 = arith.constant dense<0.000000e+00> : vector<16x8xf32>
    %61 = tpu.matmul %59, %57, %cst_53 {dimension_numbers = #tpu.dot_dimension_numbers<[1], [0], [0], [1], [0, 0, 1, 1], [], []>} : vector<16x4xf32>, vector<4x8xf32>, vector<16x8xf32> -> vector<16x8xf32>
    %62 = arith.addf %55, %60 : vector<16x8xf32>
    %63 = arith.addf %56, %61 : vector<16x8xf32>
    %c64 = arith.constant 64 : index
    %c0_54 = arith.constant 0 : index
    %64 = vector.load %arg1[%c64, %c0_54] : memref<256x128xf32, #tpu.memory_space<vmem>>, vector<4x8xf32>
    %c2_55 = arith.constant 2 : index
    %c0_56 = arith.constant 0 : index
    %65 = tpu.strided_load %arg4[%c2_55, %c0_56] {strides = array<i32: 4, 1>} : memref<70x4xf32, #tpu.memory_space<vmem>>, vector<16x4xf32>
    %c4_57 = arith.constant 4 : index
    %c0_58 = arith.constant 0 : index
    %66 = tpu.strided_load %arg4[%c4_57, %c0_58] {strides = array<i32: 4, 1>} : memref<70x4xf32, #tpu.memory_space<vmem>>, vector<16x4xf32>
    %cst_59 = arith.constant dense<0.000000e+00> : vector<16x8xf32>
    %67 = tpu.matmul %65, %64, %cst_59 {dimension_numbers = #tpu.dot_dimension_numbers<[1], [0], [0], [1], [0, 0, 1, 1], [], []>} : vector<16x4xf32>, vector<4x8xf32>, vector<16x8xf32> -> vector<16x8xf32>
    %cst_60 = arith.constant dense<0.000000e+00> : vector<16x8xf32>
    %68 = tpu.matmul %66, %64, %cst_60 {dimension_numbers = #tpu.dot_dimension_numbers<[1], [0], [0], [1], [0, 0, 1, 1], [], []>} : vector<16x4xf32>, vector<4x8xf32>, vector<16x8xf32> -> vector<16x8xf32>
    %69 = arith.addf %62, %67 : vector<16x8xf32>
    %70 = arith.addf %63, %68 : vector<16x8xf32>
    %c72 = arith.constant 72 : index
    %c0_61 = arith.constant 0 : index
    %71 = vector.load %arg1[%c72, %c0_61] : memref<256x128xf32, #tpu.memory_space<vmem>>, vector<4x8xf32>
    %c3_62 = arith.constant 3 : index
    %c0_63 = arith.constant 0 : index
    %72 = tpu.strided_load %arg4[%c3_62, %c0_63] {strides = array<i32: 4, 1>} : memref<70x4xf32, #tpu.memory_space<vmem>>, vector<16x4xf32>
    %c5_64 = arith.constant 5 : index
    %c0_65 = arith.constant 0 : index
    %73 = tpu.strided_load %arg4[%c5_64, %c0_65] {strides = array<i32: 4, 1>} : memref<70x4xf32, #tpu.memory_space<vmem>>, vector<16x4xf32>
    %cst_66 = arith.constant dense<0.000000e+00> : vector<16x8xf32>
    %74 = tpu.matmul %72, %71, %cst_66 {dimension_numbers = #tpu.dot_dimension_numbers<[1], [0], [0], [1], [0, 0, 1, 1], [], []>} : vector<16x4xf32>, vector<4x8xf32>, vector<16x8xf32> -> vector<16x8xf32>
    %cst_67 = arith.constant dense<0.000000e+00> : vector<16x8xf32>
    %75 = tpu.matmul %73, %71, %cst_67 {dimension_numbers = #tpu.dot_dimension_numbers<[1], [0], [0], [1], [0, 0, 1, 1], [], []>} : vector<16x4xf32>, vector<4x8xf32>, vector<16x8xf32> -> vector<16x8xf32>
    %76 = arith.addf %69, %74 : vector<16x8xf32>
    %77 = arith.addf %70, %75 : vector<16x8xf32>
    %c80 = arith.constant 80 : index
    %c0_68 = arith.constant 0 : index
    %78 = vector.load %arg1[%c80, %c0_68] : memref<256x128xf32, #tpu.memory_space<vmem>>, vector<4x8xf32>
    %c4_69 = arith.constant 4 : index
    %c0_70 = arith.constant 0 : index
    %79 = tpu.strided_load %arg4[%c4_69, %c0_70] {strides = array<i32: 4, 1>} : memref<70x4xf32, #tpu.memory_space<vmem>>, vector<16x4xf32>
    %c6_71 = arith.constant 6 : index
    %c0_72 = arith.constant 0 : index
    %80 = tpu.strided_load %arg4[%c6_71, %c0_72] {strides = array<i32: 4, 1>} : memref<70x4xf32, #tpu.memory_space<vmem>>, vector<16x4xf32>
    %cst_73 = arith.constant dense<0.000000e+00> : vector<16x8xf32>
    %81 = tpu.matmul %79, %78, %cst_73 {dimension_numbers = #tpu.dot_dimension_numbers<[1], [0], [0], [1], [0, 0, 1, 1], [], []>} : vector<16x4xf32>, vector<4x8xf32>, vector<16x8xf32> -> vector<16x8xf32>
    %cst_74 = arith.constant dense<0.000000e+00> : vector<16x8xf32>
    %82 = tpu.matmul %80, %78, %cst_74 {dimension_numbers = #tpu.dot_dimension_numbers<[1], [0], [0], [1], [0, 0, 1, 1], [], []>} : vector<16x4xf32>, vector<4x8xf32>, vector<16x8xf32> -> vector<16x8xf32>
    %83 = arith.addf %76, %81 : vector<16x8xf32>
    %84 = arith.addf %77, %82 : vector<16x8xf32>
    %c88 = arith.constant 88 : index
    %c0_75 = arith.constant 0 : index
    %85 = vector.load %arg1[%c88, %c0_75] : memref<256x128xf32, #tpu.memory_space<vmem>>, vector<4x8xf32>
    %c5_76 = arith.constant 5 : index
    %c0_77 = arith.constant 0 : index
    %86 = tpu.strided_load %arg4[%c5_76, %c0_77] {strides = array<i32: 4, 1>} : memref<70x4xf32, #tpu.memory_space<vmem>>, vector<16x4xf32>
    %c7_78 = arith.constant 7 : index
    %c0_79 = arith.constant 0 : index
    %87 = tpu.strided_load %arg4[%c7_78, %c0_79] {strides = array<i32: 4, 1>} : memref<70x4xf32, #tpu.memory_space<vmem>>, vector<16x4xf32>
    %cst_80 = arith.constant dense<0.000000e+00> : vector<16x8xf32>
    %88 = tpu.matmul %86, %85, %cst_80 {dimension_numbers = #tpu.dot_dimension_numbers<[1], [0], [0], [1], [0, 0, 1, 1], [], []>} : vector<16x4xf32>, vector<4x8xf32>, vector<16x8xf32> -> vector<16x8xf32>
    %cst_81 = arith.constant dense<0.000000e+00> : vector<16x8xf32>
    %89 = tpu.matmul %87, %85, %cst_81 {dimension_numbers = #tpu.dot_dimension_numbers<[1], [0], [0], [1], [0, 0, 1, 1], [], []>} : vector<16x4xf32>, vector<4x8xf32>, vector<16x8xf32> -> vector<16x8xf32>
    %90 = arith.addf %83, %88 : vector<16x8xf32>
    %91 = arith.addf %84, %89 : vector<16x8xf32>
    %c96 = arith.constant 96 : index
    %c0_82 = arith.constant 0 : index
    %92 = vector.load %arg1[%c96, %c0_82] : memref<256x128xf32, #tpu.memory_space<vmem>>, vector<4x8xf32>
    %c6_83 = arith.constant 6 : index
    %c0_84 = arith.constant 0 : index
    %93 = tpu.strided_load %arg4[%c6_83, %c0_84] {strides = array<i32: 4, 1>} : memref<70x4xf32, #tpu.memory_space<vmem>>, vector<16x4xf32>
    %c8_85 = arith.constant 8 : index
    %c0_86 = arith.constant 0 : index
    %94 = tpu.strided_load %arg4[%c8_85, %c0_86] {strides = array<i32: 4, 1>} : memref<70x4xf32, #tpu.memory_space<vmem>>, vector<16x4xf32>
    %cst_87 = arith.constant dense<0.000000e+00> : vector<16x8xf32>
    %95 = tpu.matmul %93, %92, %cst_87 {dimension_numbers = #tpu.dot_dimension_numbers<[1], [0], [0], [1], [0, 0, 1, 1], [], []>} : vector<16x4xf32>, vector<4x8xf32>, vector<16x8xf32> -> vector<16x8xf32>
    %cst_88 = arith.constant dense<0.000000e+00> : vector<16x8xf32>
    %96 = tpu.matmul %94, %92, %cst_88 {dimension_numbers = #tpu.dot_dimension_numbers<[1], [0], [0], [1], [0, 0, 1, 1], [], []>} : vector<16x4xf32>, vector<4x8xf32>, vector<16x8xf32> -> vector<16x8xf32>
    %97 = arith.addf %90, %95 : vector<16x8xf32>
    %98 = arith.addf %91, %96 : vector<16x8xf32>
    %c104 = arith.constant 104 : index
    %c0_89 = arith.constant 0 : index
    %99 = vector.load %arg1[%c104, %c0_89] : memref<256x128xf32, #tpu.memory_space<vmem>>, vector<4x8xf32>
    %c7_90 = arith.constant 7 : index
    %c0_91 = arith.constant 0 : index
    %100 = tpu.strided_load %arg4[%c7_90, %c0_91] {strides = array<i32: 4, 1>} : memref<70x4xf32, #tpu.memory_space<vmem>>, vector<16x4xf32>
    %c9 = arith.constant 9 : index
    %c0_92 = arith.constant 0 : index
    %101 = tpu.strided_load %arg4[%c9, %c0_92] {strides = array<i32: 4, 1>} : memref<70x4xf32, #tpu.memory_space<vmem>>, vector<16x4xf32>
    %cst_93 = arith.constant dense<0.000000e+00> : vector<16x8xf32>
    %102 = tpu.matmul %100, %99, %cst_93 {dimension_numbers = #tpu.dot_dimension_numbers<[1], [0], [0], [1], [0, 0, 1, 1], [], []>} : vector<16x4xf32>, vector<4x8xf32>, vector<16x8xf32> -> vector<16x8xf32>
    %cst_94 = arith.constant dense<0.000000e+00> : vector<16x8xf32>
    %103 = tpu.matmul %101, %99, %cst_94 {dimension_numbers = #tpu.dot_dimension_numbers<[1], [0], [0], [1], [0, 0, 1, 1], [], []>} : vector<16x4xf32>, vector<4x8xf32>, vector<16x8xf32> -> vector<16x8xf32>
    %104 = arith.addf %97, %102 : vector<16x8xf32>
    %105 = arith.addf %98, %103 : vector<16x8xf32>
    %c153 = arith.constant 153 : index
    %c0_95 = arith.constant 0 : index
    %106 = vector.load %arg1[%c153, %c0_95] : memref<256x128xf32, #tpu.memory_space<vmem>>, vector<1x8xf32>
    %107 = arith.maximumf %104, %105 : vector<16x8xf32>
    %108 = vector.broadcast %106 : vector<1x8xf32> to vector<16x8xf32>
    %109 = arith.addf %107, %108 : vector<16x8xf32>
    %cst_96 = arith.constant 5.000000e-01 : f32
    %110 = vector.broadcast %cst_96 : f32 to vector<16x8xf32>
    %111 = arith.mulf %110, %109 : vector<16x8xf32>
    %112 = math.tanh %111 : vector<16x8xf32>
    %cst_97 = arith.constant 5.000000e-01 : f32
    %113 = vector.broadcast %cst_97 : f32 to vector<16x8xf32>
    %114 = arith.mulf %113, %112 : vector<16x8xf32>
    %cst_98 = arith.constant 5.000000e-01 : f32
    %115 = vector.broadcast %cst_98 : f32 to vector<16x8xf32>
    %116 = arith.addf %114, %115 : vector<16x8xf32>
    %c0_99 = arith.constant 0 : index
    %c0_100 = arith.constant 0 : index
    %117 = vector.load %arg5[%c0_99, %c0_100] : memref<16x8xf32, #tpu.memory_space<vmem>>, vector<16x8xf32>
    tpu.vector_store %arg5[%c0_99, %c0_100], %116 {strides = array<i32>} : memref<16x8xf32, #tpu.memory_space<vmem>>, vector<16x8xf32>,
    %c112 = arith.constant 112 : index
    %c0_101 = arith.constant 0 : index
    %118 = vector.load %arg1[%c112, %c0_101] : memref<256x128xf32, #tpu.memory_space<vmem>>, vector<8x16xf32>
    %c0_102 = arith.constant 0 : index
    %c0_103 = arith.constant 0 : index
    %119 = tpu.strided_load %arg5[%c0_102, %c0_103] {strides = array<i32: 4, 1>} : memref<16x8xf32, #tpu.memory_space<vmem>>, vector<3x8xf32>
    %c2_104 = arith.constant 2 : index
    %c0_105 = arith.constant 0 : index
    %120 = tpu.strided_load %arg5[%c2_104, %c0_105] {strides = array<i32: 4, 1>} : memref<16x8xf32, #tpu.memory_space<vmem>>, vector<3x8xf32>
    %cst_106 = arith.constant dense<0.000000e+00> : vector<3x16xf32>
    %121 = tpu.matmul %119, %118, %cst_106 {dimension_numbers = #tpu.dot_dimension_numbers<[1], [0], [0], [1], [0, 0, 1, 1], [], []>} : vector<3x8xf32>, vector<8x16xf32>, vector<3x16xf32> -> vector<3x16xf32>
    %cst_107 = arith.constant dense<0.000000e+00> : vector<3x16xf32>
    %122 = tpu.matmul %120, %118, %cst_107 {dimension_numbers = #tpu.dot_dimension_numbers<[1], [0], [0], [1], [0, 0, 1, 1], [], []>} : vector<3x8xf32>, vector<8x16xf32>, vector<3x16xf32> -> vector<3x16xf32>
    %c120 = arith.constant 120 : index
    %c0_108 = arith.constant 0 : index
    %123 = vector.load %arg1[%c120, %c0_108] : memref<256x128xf32, #tpu.memory_space<vmem>>, vector<8x16xf32>
    %c1_109 = arith.constant 1 : index
    %c0_110 = arith.constant 0 : index
    %124 = tpu.strided_load %arg5[%c1_109, %c0_110] {strides = array<i32: 4, 1>} : memref<16x8xf32, #tpu.memory_space<vmem>>, vector<3x8xf32>
    %c3_111 = arith.constant 3 : index
    %c0_112 = arith.constant 0 : index
    %125 = tpu.strided_load %arg5[%c3_111, %c0_112] {strides = array<i32: 4, 1>} : memref<16x8xf32, #tpu.memory_space<vmem>>, vector<3x8xf32>
    %cst_113 = arith.constant dense<0.000000e+00> : vector<3x16xf32>
    %126 = tpu.matmul %124, %123, %cst_113 {dimension_numbers = #tpu.dot_dimension_numbers<[1], [0], [0], [1], [0, 0, 1, 1], [], []>} : vector<3x8xf32>, vector<8x16xf32>, vector<3x16xf32> -> vector<3x16xf32>
    %cst_114 = arith.constant dense<0.000000e+00> : vector<3x16xf32>
    %127 = tpu.matmul %125, %123, %cst_114 {dimension_numbers = #tpu.dot_dimension_numbers<[1], [0], [0], [1], [0, 0, 1, 1], [], []>} : vector<3x8xf32>, vector<8x16xf32>, vector<3x16xf32> -> vector<3x16xf32>
    %128 = arith.addf %121, %126 : vector<3x16xf32>
    %129 = arith.addf %122, %127 : vector<3x16xf32>
    %c128 = arith.constant 128 : index
    %c0_115 = arith.constant 0 : index
    %130 = vector.load %arg1[%c128, %c0_115] : memref<256x128xf32, #tpu.memory_space<vmem>>, vector<8x16xf32>
    %c2_116 = arith.constant 2 : index
    %c0_117 = arith.constant 0 : index
    %131 = tpu.strided_load %arg5[%c2_116, %c0_117] {strides = array<i32: 4, 1>} : memref<16x8xf32, #tpu.memory_space<vmem>>, vector<3x8xf32>
    %c4_118 = arith.constant 4 : index
    %c0_119 = arith.constant 0 : index
    %132 = tpu.strided_load %arg5[%c4_118, %c0_119] {strides = array<i32: 4, 1>} : memref<16x8xf32, #tpu.memory_space<vmem>>, vector<3x8xf32>
    %cst_120 = arith.constant dense<0.000000e+00> : vector<3x16xf32>
    %133 = tpu.matmul %131, %130, %cst_120 {dimension_numbers = #tpu.dot_dimension_numbers<[1], [0], [0], [1], [0, 0, 1, 1], [], []>} : vector<3x8xf32>, vector<8x16xf32>, vector<3x16xf32> -> vector<3x16xf32>
    %cst_121 = arith.constant dense<0.000000e+00> : vector<3x16xf32>
    %134 = tpu.matmul %132, %130, %cst_121 {dimension_numbers = #tpu.dot_dimension_numbers<[1], [0], [0], [1], [0, 0, 1, 1], [], []>} : vector<3x8xf32>, vector<8x16xf32>, vector<3x16xf32> -> vector<3x16xf32>
    %135 = arith.addf %128, %133 : vector<3x16xf32>
    %136 = arith.addf %129, %134 : vector<3x16xf32>
    %c136 = arith.constant 136 : index
    %c0_122 = arith.constant 0 : index
    %137 = vector.load %arg1[%c136, %c0_122] : memref<256x128xf32, #tpu.memory_space<vmem>>, vector<8x16xf32>
    %c3_123 = arith.constant 3 : index
    %c0_124 = arith.constant 0 : index
    %138 = tpu.strided_load %arg5[%c3_123, %c0_124] {strides = array<i32: 4, 1>} : memref<16x8xf32, #tpu.memory_space<vmem>>, vector<3x8xf32>
    %c5_125 = arith.constant 5 : index
    %c0_126 = arith.constant 0 : index
    %139 = tpu.strided_load %arg5[%c5_125, %c0_126] {strides = array<i32: 4, 1>} : memref<16x8xf32, #tpu.memory_space<vmem>>, vector<3x8xf32>
    %cst_127 = arith.constant dense<0.000000e+00> : vector<3x16xf32>
    %140 = tpu.matmul %138, %137, %cst_127 {dimension_numbers = #tpu.dot_dimension_numbers<[1], [0], [0], [1], [0, 0, 1, 1], [], []>} : vector<3x8xf32>, vector<8x16xf32>, vector<3x16xf32> -> vector<3x16xf32>
    %cst_128 = arith.constant dense<0.000000e+00> : vector<3x16xf32>
    %141 = tpu.matmul %139, %137, %cst_128 {dimension_numbers = #tpu.dot_dimension_numbers<[1], [0], [0], [1], [0, 0, 1, 1], [], []>} : vector<3x8xf32>, vector<8x16xf32>, vector<3x16xf32> -> vector<3x16xf32>
    %142 = arith.addf %135, %140 : vector<3x16xf32>
    %143 = arith.addf %136, %141 : vector<3x16xf32>
    %c144 = arith.constant 144 : index
    %c0_129 = arith.constant 0 : index
    %144 = vector.load %arg1[%c144, %c0_129] : memref<256x128xf32, #tpu.memory_space<vmem>>, vector<8x16xf32>
    %c4_130 = arith.constant 4 : index
    %c0_131 = arith.constant 0 : index
    %145 = tpu.strided_load %arg5[%c4_130, %c0_131] {strides = array<i32: 4, 1>} : memref<16x8xf32, #tpu.memory_space<vmem>>, vector<3x8xf32>
    %c6_132 = arith.constant 6 : index
    %c0_133 = arith.constant 0 : index
    %146 = tpu.strided_load %arg5[%c6_132, %c0_133] {strides = array<i32: 4, 1>} : memref<16x8xf32, #tpu.memory_space<vmem>>, vector<3x8xf32>
    %cst_134 = arith.constant dense<0.000000e+00> : vector<3x16xf32>
    %147 = tpu.matmul %145, %144, %cst_134 {dimension_numbers = #tpu.dot_dimension_numbers<[1], [0], [0], [1], [0, 0, 1, 1], [], []>} : vector<3x8xf32>, vector<8x16xf32>, vector<3x16xf32> -> vector<3x16xf32>
    %cst_135 = arith.constant dense<0.000000e+00> : vector<3x16xf32>
    %148 = tpu.matmul %146, %144, %cst_135 {dimension_numbers = #tpu.dot_dimension_numbers<[1], [0], [0], [1], [0, 0, 1, 1], [], []>} : vector<3x8xf32>, vector<8x16xf32>, vector<3x16xf32> -> vector<3x16xf32>
    %149 = arith.addf %142, %147 : vector<3x16xf32>
    %150 = arith.addf %143, %148 : vector<3x16xf32>
    %c154 = arith.constant 154 : index
    %c0_136 = arith.constant 0 : index
    %151 = vector.load %arg1[%c154, %c0_136] : memref<256x128xf32, #tpu.memory_space<vmem>>, vector<1x16xf32>
    %152 = arith.maximumf %149, %150 : vector<3x16xf32>
    %153 = vector.broadcast %151 : vector<1x16xf32> to vector<3x16xf32>
    %154 = arith.addf %152, %153 : vector<3x16xf32>
    %cst_137 = arith.constant 5.000000e-01 : f32
    %155 = vector.broadcast %cst_137 : f32 to vector<3x16xf32>
    %156 = arith.mulf %155, %154 : vector<3x16xf32>
    %157 = math.tanh %156 : vector<3x16xf32>
    %cst_138 = arith.constant 5.000000e-01 : f32
    %158 = vector.broadcast %cst_138 : f32 to vector<3x16xf32>
    %159 = arith.mulf %158, %157 : vector<3x16xf32>
    %cst_139 = arith.constant 5.000000e-01 : f32
    %160 = vector.broadcast %cst_139 : f32 to vector<3x16xf32>
    %161 = arith.addf %159, %160 : vector<3x16xf32>
    %c208 = arith.constant 208 : index
    %c0_140 = arith.constant 0 : index
    %162 = vector.load %arg1[%c208, %c0_140] : memref<256x128xf32, #tpu.memory_space<vmem>>, vector<1x30xf32>
    %c160 = arith.constant 160 : index
    %c0_141 = arith.constant 0 : index
    %163 = vector.load %arg1[%c160, %c0_141] : memref<256x128xf32, #tpu.memory_space<vmem>>, vector<16x30xf32>
    %164 = vector.extract_strided_slice %161 {offsets = [0, 0], sizes = [1, 16], strides = [1, 1]} : vector<3x16xf32> to vector<1x16xf32>
    %cst_142 = arith.constant dense<0.000000e+00> : vector<1x30xf32>
    %165 = tpu.matmul %164, %163, %cst_142 {dimension_numbers = #tpu.dot_dimension_numbers<[1], [0], [0], [1], [0, 0, 1, 1], [], []>} : vector<1x16xf32>, vector<16x30xf32>, vector<1x30xf32> -> vector<1x30xf32>
    %166 = arith.addf %162, %165 : vector<1x30xf32>
    %c176 = arith.constant 176 : index
    %c0_143 = arith.constant 0 : index
    %167 = vector.load %arg1[%c176, %c0_143] : memref<256x128xf32, #tpu.memory_space<vmem>>, vector<16x30xf32>
    %168 = vector.extract_strided_slice %161 {offsets = [1, 0], sizes = [1, 16], strides = [1, 1]} : vector<3x16xf32> to vector<1x16xf32>
    %cst_144 = arith.constant dense<0.000000e+00> : vector<1x30xf32>
    %169 = tpu.matmul %168, %167, %cst_144 {dimension_numbers = #tpu.dot_dimension_numbers<[1], [0], [0], [1], [0, 0, 1, 1], [], []>} : vector<1x16xf32>, vector<16x30xf32>, vector<1x30xf32> -> vector<1x30xf32>
    %170 = arith.addf %166, %169 : vector<1x30xf32>
    %c192 = arith.constant 192 : index
    %c0_145 = arith.constant 0 : index
    %171 = vector.load %arg1[%c192, %c0_145] : memref<256x128xf32, #tpu.memory_space<vmem>>, vector<16x30xf32>
    %172 = vector.extract_strided_slice %161 {offsets = [2, 0], sizes = [1, 16], strides = [1, 1]} : vector<3x16xf32> to vector<1x16xf32>
    %cst_146 = arith.constant dense<0.000000e+00> : vector<1x30xf32>
    %173 = tpu.matmul %172, %171, %cst_146 {dimension_numbers = #tpu.dot_dimension_numbers<[1], [0], [0], [1], [0, 0, 1, 1], [], []>} : vector<1x16xf32>, vector<16x30xf32>, vector<1x30xf32> -> vector<1x30xf32>
    %174 = arith.addf %170, %173 : vector<1x30xf32>
    %cst_147 = arith.constant 5.000000e-01 : f32
    %175 = vector.broadcast %cst_147 : f32 to vector<1x30xf32>
    %176 = arith.mulf %175, %174 : vector<1x30xf32>
    %177 = math.tanh %176 : vector<1x30xf32>
    %cst_148 = arith.constant 5.000000e-01 : f32
    %178 = vector.broadcast %cst_148 : f32 to vector<1x30xf32>
    %179 = arith.mulf %178, %177 : vector<1x30xf32>
    %cst_149 = arith.constant 5.000000e-01 : f32
    %180 = vector.broadcast %cst_149 : f32 to vector<1x30xf32>
    %181 = arith.addf %179, %180 : vector<1x30xf32>
    %c216 = arith.constant 216 : index
    %c0_150 = arith.constant 0 : index
    %182 = vector.load %arg1[%c216, %c0_150] : memref<256x128xf32, #tpu.memory_space<vmem>>, vector<30x30xf32>
    %cst_151 = arith.constant dense<0.000000e+00> : vector<1x30xf32>
    %183 = tpu.matmul %181, %182, %cst_151 {dimension_numbers = #tpu.dot_dimension_numbers<[1], [0], [0], [1], [0, 0, 1, 1], [], []>} : vector<1x30xf32>, vector<30x30xf32>, vector<1x30xf32> -> vector<1x30xf32>
    %c248 = arith.constant 248 : index
    %c0_152 = arith.constant 0 : index
    %184 = vector.load %arg1[%c248, %c0_152] : memref<256x128xf32, #tpu.memory_space<vmem>>, vector<1x30xf32>
    %185 = arith.addf %183, %184 : vector<1x30xf32>
    %cst_153 = arith.constant 5.000000e-01 : f32
    %186 = vector.broadcast %cst_153 : f32 to vector<1x30xf32>
    %187 = arith.mulf %186, %185 : vector<1x30xf32>
    %188 = math.tanh %187 : vector<1x30xf32>
    %cst_154 = arith.constant 5.000000e-01 : f32
    %189 = vector.broadcast %cst_154 : f32 to vector<1x30xf32>
    %190 = arith.mulf %189, %188 : vector<1x30xf32>
    %cst_155 = arith.constant 5.000000e-01 : f32
    %191 = vector.broadcast %cst_155 : f32 to vector<1x30xf32>
    %192 = arith.addf %190, %191 : vector<1x30xf32>
    %c0_156 = arith.constant 0 : index
    %c0_157 = arith.constant 0 : index
    %193 = vector.load %arg2[%c0_156, %c0_157] : memref<32x1024xf32, #tpu.memory_space<vmem>>, vector<30x1024xf32>
    %cst_158 = arith.constant dense<0.000000e+00> : vector<1x1024xf32>
    %194 = tpu.matmul %192, %193, %cst_158 {dimension_numbers = #tpu.dot_dimension_numbers<[1], [0], [0], [1], [0, 0, 1, 1], [], []>} : vector<1x30xf32>, vector<30x1024xf32>, vector<1x1024xf32> -> vector<1x1024xf32>
    %c30 = arith.constant 30 : index
    %c0_159 = arith.constant 0 : index
    %195 = vector.load %arg2[%c30, %c0_159] : memref<32x1024xf32, #tpu.memory_space<vmem>>, vector<1x1024xf32>
    %196 = arith.addf %194, %195 : vector<1x1024xf32>
    %cst_160 = arith.constant 5.000000e-01 : f32
    %197 = vector.broadcast %cst_160 : f32 to vector<1x1024xf32>
    %198 = arith.mulf %197, %196 : vector<1x1024xf32>
    %199 = math.tanh %198 : vector<1x1024xf32>
    %cst_161 = arith.constant 5.000000e-01 : f32
    %200 = vector.broadcast %cst_161 : f32 to vector<1x1024xf32>
    %201 = arith.mulf %200, %199 : vector<1x1024xf32>
    %cst_162 = arith.constant 5.000000e-01 : f32
    %202 = vector.broadcast %cst_162 : f32 to vector<1x1024xf32>
    %203 = arith.addf %201, %202 : vector<1x1024xf32>
    %c0_163 = arith.constant 0 : index
    %c0_164 = arith.constant 0 : index
    %204 = vector.load %arg3[%c0_163, %c0_164] : memref<1x1024xf32, #tpu.memory_space<vmem>>, vector<1x1024xf32>
    tpu.vector_store %arg3[%c0_163, %c0_164], %203 {strides = array<i32>} : memref<1x1024xf32, #tpu.memory_space<vmem>>, vector<1x1024xf32>,
    return
  }
}

</mosaic_0001>

<bundles_post_ra>
// kernel: squeeze.1
= control target key start
LH: loop header
LB: loop body
LE: loop exit
PB: predicated region body
PF: predicated region fallthrough
CT: control target
= control target key end

     0   :  { %vm161_vm0 = vcmask 834560   ;;  %vm189_vm1 = vcmask 900096   ;;  %s350_s14 = smov 26   ;;  %vm175_vm2 = vcmask 850944   ;;  %s351_s19 = smov 18   ;;  %vm203_vm3 = vcmask 916480   ;;  %s536_s0 = inlined_call_operand.vmem [shape: f32[900], index: 0, kind: input, shape index: {}]   ;;  %s537_s1 = inlined_call_operand.hbm [shape: f32[30,30], index: 1, kind: output, shape index: {}]  }
   0x1   :  { %v283_v0 = vld [vmem:[%s536_s0 + $0x6] sm:$0x1]   ;;  %v284_v1 = vld [vmem:[%s536_s0 + $0x7] sm:$0x1]   ;;  %v287_v3 = vld [vmem:[%s536_s0 + $0x5] sm:$0x1]  }
   0x2   :  { %v162_v2 = vsel %vm161_vm0, %v284_v1, %v283_v0  ;;  %v288_v4 = vld [vmem:[%s536_s0 + $0x6] sm:$0x1]   ;;  %v285_v6 = vld [vmem:[%s536_s0 + $0x2] sm:$0x1]   ;;  %v286_v7 = vld [vmem:[%s536_s0 + $0x3] sm:$0x1]  }
   0x3   :  { %163 = vrot.lane.b32.xlu0 %v162_v2, %s350_s14  ;;  %v190_v5 = vsel %vm189_vm1, %v288_v4, %v287_v3  ;;  %v176_v8 = vsel %vm175_vm2, %v286_v7, %v285_v6  ;;  %v289_v9 = vld [vmem:[%s536_s0 + $0x1] sm:$0x1]   ;;  %v290_v10 = vld [vmem:[%s536_s0 + $0x2] sm:$0x1]   ;;  %v291_v12 = vld [vmem:[%s536_s0 + $0x4] sm:$0x1]  }
   0x4   :  { %191 = vrot.lane.b32.xlu1 %v190_v5, %s351_s19  ;;  %v204_v11 = vsel %vm203_vm3, %v290_v10, %v289_v9  ;;  %v292_v13 = vld [vmem:[%s536_s0 + $0x5] sm:$0x1]   ;;  %vm217_vm4 = vcmask 965632   ;;  %v227_v14 = vld [vmem:[%s536_s0] sm:$0x1]   ;;  %vm230_vm5 = vcmask 982016  }
   0x5   :  { %v293_v15 = vld [vmem:[%s536_s0 + $0x1] sm:$0x1]   ;;  %s352_s3 = smov 24   ;;  %s353_s4 = smov 16   ;;  %v218_v16 = vsel %vm217_vm4, %v292_v13, %v291_v12  ;;  %v294_v18 = vld [vmem:[%s536_s0 + $0x3] sm:$0x1]  }
   0x6   :  { %v231_v17 = vsel %vm230_vm5, %v293_v15, %v227_v14  ;;  %v295_v19 = vld [vmem:[%s536_s0 + $0x4] sm:$0x1]   ;;  %vm244_vm6 = vcmask 1031168   ;;  %s354_s9 = smov 10   ;;  %s355_s10 = smov 8  }
   0x7   :  { %177 = vrot.lane.b32.xlu0 %v176_v8, %s352_s3  ;;  %v245_v20 = vsel %vm244_vm6, %v295_v19, %v294_v18  ;;  %v264_v21 = vld [vmem:[%s536_s0 + $0x3] sm:$0x1]   ;;  %s356_s13 = smov 2   ;;  %v265_v22 = vld [vmem:[%s536_s0 + $0x6] sm:$0x1]   ;;  %s357_s16 = smov 122  }
   0x8   :  { %205 = vrot.lane.b32.xlu1 %v204_v11, %s353_s4  ;;  %v266_v23 = vld [vmem:[%s536_s0 + $0x2] sm:$0x1]   ;;  %s358_s19 = smov 116  }
   0xb   :  { %219 = vrot.lane.b32.xlu0 %v218_v16, %s354_s9 }
   0xc   :  { %232 = vrot.lane.b32.xlu1 %v231_v17, %s355_s10 }
   0xf   :  { %246 = vrot.lane.b32.xlu0 %v245_v20, %s356_s13 }
  0x10   :  { %8 = vrot.lane.b32.xlu1 %v264_v21, %s357_s16 }
  0x13   :  { %15 = vrot.lane.b32.xlu0 %v265_v22, %s358_s19 }
  0x14   :  { %2 = vsyncpa [#allocation1], 0  ;;  %v267_v24 = vld [vmem:[%s536_s0 + $0x5] sm:$0x1]   ;;  %s359_s22 = smov 114   ;;  %s360_s25 = smov 108  }
  0x15   :  { %22 = vrot.lane.b32.xlu1 %v266_v23, %s359_s22  ;;  %v268_v25 = vld [vmem:[%s536_s0 + $0x1] sm:$0x1]   ;;  %v269_v26 = vld [vmem:[%s536_s0 + $0x4] sm:$0x1]   ;;  %s361_s28 = smov 106   ;;  %s362_s2 = smov 100  }
  0x16   :  { %v48_v27 = vld [vmem:[%s536_s0] sm:$0x1]   ;;  %v270_v28 = vld [vmem:[%s536_s0 + $0x3] sm:$0x1]   ;;  %s363_s5 = smov 98   ;;  %s364_s8 = smov 92  }
  0x17   :  { %29 = vrot.lane.b32.xlu0 %v267_v24, %s360_s25  ;;  %v271_v29 = vld [vmem:[%s536_s0 + $0x6] sm:$0x1]   ;;  %v272_v30 = vld [vmem:[%s536_s0 + $0x2] sm:$0x1]   ;;  %s365_s11 = smov 86   ;;  %s366_s14 = smov 84  }
  0x18   :  { %v273_v31 = vld [vmem:[%s536_s0 + $0x5] sm:$0x1]   ;;  %v274_v32 = vld [vmem:[%s536_s0 + $0x1] sm:$0x1]   ;;  %s367_s17 = smov 78   ;;  %s368_s20 = smov 76  }
  0x19   :  { %36 = vrot.lane.b32.xlu1 %v268_v25, %s361_s28  ;;  %v275_v33 = vld [vmem:[%s536_s0 + $0x4] sm:$0x1]   ;;  %v96_v34 = vld [vmem:[%s536_s0] sm:$0x1]   ;;  %s369_s23 = smov 70   ;;  %s370_s26 = smov 68  }
  0x1a   :  { %v276_v35 = vld [vmem:[%s536_s0 + $0x3] sm:$0x1]   ;;  %v277_v36 = vld [vmem:[%s536_s0 + $0x6] sm:$0x1]   ;;  %s371_s29 = smov 62   ;;  %vm4_vm7 = vcmask 244736  }
  0x1b   :  { %43 = vrot.lane.b32.xlu0 %v269_v26, %s362_s2  ;;  %v278_v37 = vld [vmem:[%s536_s0 + $0x2] sm:$0x1]   ;;  %v3_v38 = vld [vmem:[%s536_s0] sm:$0x1]   ;;  %v279_v39 = vld [vmem:[%s536_s0 + $0x5] sm:$0x1]  }
  0x1c   :  { %5 = vst.msk [vmem:[#allocation0] sm:$0x1] %vm4_vm7, %v3_v38   ;;  %v280_v40 = vld [vmem:[%s536_s0 + $0x1] sm:$0x1]   ;;  %v281_v41 = vld [vmem:[%s536_s0 + $0x4] sm:$0x1]  }
  0x1d   :  { %49 = vrot.lane.b32.xlu1 %v48_v27, %s363_s5  ;;  %s372_s5 = smov 56   ;;  %v144_v42 = vld [vmem:[%s536_s0] sm:$0x1]   ;;  %v282_v43 = vld [vmem:[%s536_s0 + $0x3] sm:$0x1]   ;;  %s377_s0 = smov 38  }
  0x1e   :  { %vm165_vm8 = vcmask 211968   ;;  %vm168_vm9 = vcmask 244944   ;;  %vm193_vm10 = vcmask 146432   ;;  %vm196_vm11 = vcmask 244880   ;;  %s379_s21 = smov [#allocation0]  }
  0x1f   :  { %56 = vrot.lane.b32.xlu0 %v270_v28, %s364_s8  ;;  %s373_s8 = smov 54   ;;  %vm179_vm12 = vcmask 195584   ;;  %vm182_vm13 = vcmask 244928   ;;  %vm207_vm14 = vcmask 130048   ;;  %vm210_vm15 = vcmask 244864   ;;  %s258_s22 = sshll.u32 %s379_s21, 4  ;;  %s259_s22 = int_to_ptr.vmem [resolvable:$true] %s258_s22 }
  0x20   :  { %vm221_vm0 = vcmask 80896   ;;  %vm224_vm1 = vcmask 244816   ;;  %vm234_vm2 = vcmask 64512   ;;  %vm237_vm3 = vcmask 244800   ;;  %p331_p1 = scmp.lt.s32.totalorder %s259_s22, %s259_s22 }
  0x21   :  { %63 = vrot.lane.b32.xlu1 %v271_v29, %s365_s11  ;;  %s374_s11 = smov 48   ;;  %vm248_vm4 = vcmask 15360   ;;  %vm251_vm5 = vcmask 244752  }
  0x23   :  { %70 = vrot.lane.b32.xlu0 %v272_v30, %s366_s14  ;;  %s375_s14 = smov 46  }
  0x25   :  { %77 = vrot.lane.b32.xlu1 %v273_v31, %s367_s17  ;;  %s376_s17 = smov 40  }
  0x27   :  { %84 = vrot.lane.b32.xlu0 %v274_v32, %s368_s20  ;;  %s378_s20 = smov 32  }
  0x29   :  { %91 = vrot.lane.b32.xlu1 %v275_v33, %s369_s23  ;;  %s326_s23 = scalar_lea.vmem %s259_s22, 512 }
  0x2a   :  { %p327_p0 = scmp.ne.s32.totalorder %s259_s22, %s326_s23  ;;  %p332_p2 = scmp.lt.s32.totalorder %s326_s23, %s326_s23 }
  0x2b   :  { %97 = vrot.lane.b32.xlu0 %v96_v34, %s370_s26 }
  0x2c   :  { %p333_p3 = por %p332_p2, %p331_p1 }
  0x2d   :  { %104 = vrot.lane.b32.xlu1 %v276_v35, %s371_s29 }
  0x2e   :  { %p334_p4 = pnand %p333_p3, %p327_p0 }
  0x2f   :  { %111 = vrot.lane.b32.xlu0 %v277_v36, %s372_s5 }
  0x31   :  { %118 = vrot.lane.b32.xlu1 %v278_v37, %s373_s8 }
  0x33   :  { %125 = vrot.lane.b32.xlu0 %v279_v39, %s374_s11 }
  0x35   :  { %132 = vrot.lane.b32.xlu1 %v280_v40, %s375_s14 }
  0x37   :  { %139 = vrot.lane.b32.xlu0 %v281_v41, %s376_s17 }
  0x39   :  { %145 = vrot.lane.b32.xlu1 %v144_v42, %s377_s0 }
  0x3b   :  { %152 = vrot.lane.b32.xlu0 %v282_v43, %s378_s20 }
  0x75   :  { %v164_v44 = vpop.permute.xlu0 %163  }
  0x76   :  { %167 = vst.msk [vmem:[#allocation0 + $0x1d] sm:$0x1] %vm165_vm8, %v164_v44   ;;  %v192_v45 = vpop.permute.xlu1 %191  }
  0x77   :  { %170 = vst.msk [vmem:[#allocation0 + $0x1d] sm:$0x1] %vm168_vm9, %v164_v44  }
  0x78   :  { %195 = vst.msk [vmem:[#allocation0 + $0x19] sm:$0x1] %vm193_vm10, %v192_v45  }
  0x79   :  { %198 = vst.msk [vmem:[#allocation0 + $0x19] sm:$0x1] %vm196_vm11, %v192_v45   ;;  %v178_v46 = vpop.permute.xlu0 %177  }
  0x7a   :  { %181 = vst.msk [vmem:[#allocation0 + $0xc] sm:$0x1] %vm179_vm12, %v178_v46   ;;  %v206_v47 = vpop.permute.xlu1 %205  }
  0x7b   :  { %184 = vst.msk [vmem:[#allocation0 + $0xc] sm:$0x1] %vm182_vm13, %v178_v46  }
  0x7c   :  { %209 = vst.msk [vmem:[#allocation0 + $0x8] sm:$0x1] %vm207_vm14, %v206_v47  }
  0x7d   :  { %212 = vst.msk [vmem:[#allocation0 + $0x8] sm:$0x1] %vm210_vm15, %v206_v47   ;;  %v220_v48 = vpop.permute.xlu0 %219  }
  0x7e   :  { %223 = vst.msk [vmem:[#allocation0 + $0x15] sm:$0x1] %vm221_vm0, %v220_v48   ;;  %v233_v49 = vpop.permute.xlu1 %232  }
  0x7f   :  { %226 = vst.msk [vmem:[#allocation0 + $0x15] sm:$0x1] %vm224_vm1, %v220_v48  }
  0x80   :  { %236 = vst.msk [vmem:[#allocation0 + $0x4] sm:$0x1] %vm234_vm2, %v233_v49  }
  0x81   :  { %239 = vst.msk [vmem:[#allocation0 + $0x4] sm:$0x1] %vm237_vm3, %v233_v49   ;;  %v247_v50 = vpop.permute.xlu0 %246  }
  0x82   :  { %250 = vst.msk [vmem:[#allocation0 + $0x11] sm:$0x1] %vm248_vm4, %v247_v50   ;;  %v9_v51 = vpop.permute.xlu1 %8  }
  0x83   :  { %253 = vst.msk [vmem:[#allocation0 + $0x11] sm:$0x1] %vm251_vm5, %v247_v50  }
  0x84   :  { %12 = vst.msk [vmem:[#allocation0 + $0xd] sm:$0x1] %vm4_vm7, %v9_v51  }
  0x85   :  { %v16_v52 = vpop.permute.xlu0 %15  }
  0x86   :  { %19 = vst.msk [vmem:[#allocation0 + $0x1a] sm:$0x1] %vm4_vm7, %v16_v52  }
  0x87   :  { %v23_v53 = vpop.permute.xlu1 %22  }
  0x88   :  { %26 = vst.msk [vmem:[#allocation0 + $0x9] sm:$0x1] %vm4_vm7, %v23_v53  }
  0x89   :  { %v30_v54 = vpop.permute.xlu0 %29  }
  0x8a   :  { %33 = vst.msk [vmem:[#allocation0 + $0x16] sm:$0x1] %vm4_vm7, %v30_v54  }
  0x8b   :  { %v37_v55 = vpop.permute.xlu1 %36  }
  0x8c   :  { %40 = vst.msk [vmem:[#allocation0 + $0x5] sm:$0x1] %vm4_vm7, %v37_v55  }
  0x8d   :  { %v44_v56 = vpop.permute.xlu0 %43  }
  0x8e   :  { %47 = vst.msk [vmem:[#allocation0 + $0x12] sm:$0x1] %vm4_vm7, %v44_v56  }
  0x8f   :  { %v50_v57 = vpop.permute.xlu1 %49  }
  0x90   :  { %53 = vst.msk [vmem:[#allocation0 + $0x1] sm:$0x1] %vm4_vm7, %v50_v57  }
  0x91   :  { %v57_v58 = vpop.permute.xlu0 %56  }
  0x92   :  { %60 = vst.msk [vmem:[#allocation0 + $0xe] sm:$0x1] %vm4_vm7, %v57_v58  }
  0x93   :  { %v64_v59 = vpop.permute.xlu1 %63  }
  0x94   :  { %67 = vst.msk [vmem:[#allocation0 + $0x1b] sm:$0x1] %vm4_vm7, %v64_v59  }
  0x95   :  { %v71_v60 = vpop.permute.xlu0 %70  }
  0x96   :  { %74 = vst.msk [vmem:[#allocation0 + $0xa] sm:$0x1] %vm4_vm7, %v71_v60  }
  0x97   :  { %v78_v61 = vpop.permute.xlu1 %77  }
  0x98   :  { %81 = vst.msk [vmem:[#allocation0 + $0x17] sm:$0x1] %vm4_vm7, %v78_v61  }
  0x99   :  { %v85_v62 = vpop.permute.xlu0 %84  }
  0x9a   :  { %88 = vst.msk [vmem:[#allocation0 + $0x6] sm:$0x1] %vm4_vm7, %v85_v62  }
  0x9b   :  { %v92_v63 = vpop.permute.xlu1 %91  }
  0x9c   :  { %95 = vst.msk [vmem:[#allocation0 + $0x13] sm:$0x1] %vm4_vm7, %v92_v63  }
  0x9d   :  { %v98_v0 = vpop.permute.xlu0 %97  }
  0x9e   :  { %101 = vst.msk [vmem:[#allocation0 + $0x2] sm:$0x1] %vm4_vm7, %v98_v0  }
  0x9f   :  { %v105_v1 = vpop.permute.xlu1 %104  }
  0xa0   :  { %108 = vst.msk [vmem:[#allocation0 + $0xf] sm:$0x1] %vm4_vm7, %v105_v1  }
  0xa1   :  { %v112_v2 = vpop.permute.xlu0 %111  }
  0xa2   :  { %115 = vst.msk [vmem:[#allocation0 + $0x1c] sm:$0x1] %vm4_vm7, %v112_v2  }
  0xa3   :  { %v119_v3 = vpop.permute.xlu1 %118  }
  0xa4   :  { %122 = vst.msk [vmem:[#allocation0 + $0xb] sm:$0x1] %vm4_vm7, %v119_v3  }
  0xa5   :  { %v126_v4 = vpop.permute.xlu0 %125  }
  0xa6   :  { %129 = vst.msk [vmem:[#allocation0 + $0x18] sm:$0x1] %vm4_vm7, %v126_v4  }
  0xa7   :  { %v133_v5 = vpop.permute.xlu1 %132  }
  0xa8   :  { %136 = vst.msk [vmem:[#allocation0 + $0x7] sm:$0x1] %vm4_vm7, %v133_v5  }
  0xa9   :  { %v140_v6 = vpop.permute.xlu0 %139  }
  0xaa   :  { %143 = vst.msk [vmem:[#allocation0 + $0x14] sm:$0x1] %vm4_vm7, %v140_v6  }
  0xab   :  { %v146_v7 = vpop.permute.xlu1 %145  }
  0xac   :  { %149 = vst.msk [vmem:[#allocation0 + $0x3] sm:$0x1] %vm4_vm7, %v146_v7  }
  0xad   :  { %v153_v8 = vpop.permute.xlu0 %152  }
  0xae   :  { %156 = vst.msk [vmem:[#allocation0 + $0x10] sm:$0x1] %vm4_vm7, %v153_v8  }
  0xaf   :  { %337 = shalt.err (!%p334_p4)
}
  0xb0   :  { %s338_s26 = scalar_lea.hbm %s537_s1, 512 }
  0xb1   :  { %p339_p5 = scmp.ne.s32.totalorder %s537_s1, %s338_s26  ;;  %p342_p6 = scmp.lt.u32.totalorder %s338_s26, %s537_s1 }
  0xb3   :  { %p344_p7 = pnand %p342_p6, %p339_p5 }
  0xb5   :  { %347 = shalt.err (!%p344_p7)
}
  0xb6   :  { %261 = dma.vmem_to_hbm [thread:$0]  %s259_s22, 512, %s537_s1, [#allocation1]  }
  0xb7   :  { %348 = dma.done.wait [#allocation1], 512  }
  0xb8   :  { %349 = vsyncadd [#allocation1], 4294966784 }
  0xb9   :  { %263 = vsyncpa [#allocation1], 1 }

// kernel: forward_pallas.1
= control target key start
LH: loop header
LB: loop body
LE: loop exit
PB: predicated region body
PF: predicated region fallthrough
CT: control target
= control target key end

     0   :  { %8 = vsyncpa [#allocation5], 0  ;;  %s6154_s12 = smov [#allocation4]   ;;  %s7152_s0 = inlined_call_operand.vmem [shape: f32[284,1], index: 0, kind: input, shape index: {}]   ;;  %s7153_s1 = inlined_call_operand.vmem [shape: f32[256,128], index: 1, kind: input, shape index: {}]   ;;  %s7154_s2 = inlined_call_operand.hbm [shape: f32[32,1024], index: 2, kind: input, shape index: {}]   ;;  %s7155_s3 = inlined_call_operand.vmem [shape: f32[1,1024], index: 3, kind: output, shape index: {}]  }
   0x1   :  { %s18_s13 = sshll.u32 %s6154_s12, 4  ;;  %s6130_s16 = scalar_lea.hbm %s7154_s2, 4096  ;;  %s19_s13 = int_to_ptr.vmem [resolvable:$true] %s18_s13 }
   0x2   :  { %p6131_p0 = scmp.ne.s32.totalorder %s7154_s2, %s6130_s16  ;;  %p6134_p1 = scmp.lt.u32.totalorder %s6130_s16, %s7154_s2 }
   0x4   :  { %p6136_p2 = pnand %p6134_p1, %p6131_p0 }
   0x6   :  { %6139 = shalt.err (!%p6136_p2)
}
   0x7   :  { %s6140_s21 = scalar_lea.vmem %s19_s13, 4096  ;;  %p6145_p4 = scmp.lt.s32.totalorder %s19_s13, %s19_s13 }
   0x8   :  { %p6141_p3 = scmp.ne.s32.totalorder %s19_s13, %s6140_s21  ;;  %p6146_p5 = scmp.lt.s32.totalorder %s6140_s21, %s6140_s21 }
   0xa   :  { %p6147_p6 = por %p6146_p5, %p6145_p4 }
   0xc   :  { %p6148_p7 = pnand %p6147_p6, %p6141_p3 }
   0xe   :  { %6151 = shalt.err (!%p6148_p7)
}
   0xf   :  { %s6155_s22 = smov 1024   ;;  %s6156_s23 = smov 64  }
  0x10   :  { %24 = dma.hbm_to_vmem [thread:$0]  %s7154_s2, 4096, %s19_s13, [#allocation5], %s6155_s22, %s6155_s22, %s6156_s23  }
  0x11   :  { %6152 = dma.done.wait [#allocation5], 4096  }
  0x12   :  { %6153 = vsyncadd [#allocation5], 4294963200  ;;  %v6157_v0 = vmov 0.0   ;;  %vm6158_vm0 = vmmov 0   ;;  %vm129_vm1 = vcmask 1040384   ;;  %vm101_vm2 = vcmask 7168  }
  0x13   :  { %5283 = vmatprep.subr.mxu0 %v6157_v0  ;;  %5312 = vmatprep.subr.mxu1 %v6157_v0  ;;  %v64_v1 = vld [vmem:[%s7153_s1 + $0x8] sm:$0x1]  ;;  %v4829_v2 = vld [vmem:[%s7152_s0 + $0x1] ss:$4 sm:$0xff]  ;;  %v6209_v3 = vld [vmem:[%s7152_s0 + $0x3] ss:$4 sm:$0xff] }
  0x14   :  { %5285 = vmatprep.mubr.msk.f32.mxu0 %vm6158_vm0, %v6157_v0  ;;  %5314 = vmatprep.mubr.msk.f32.mxu1 %vm6158_vm0, %v6157_v0  ;;  %v28_v4 = vld [vmem:[%s7153_s1] sm:$0x1]  ;;  %v4830_v5 = vld [vmem:[%s7152_s0 + $0x21] ss:$4 sm:$0xff]  ;;  %v6227_v6 = vld [vmem:[%s7152_s0 + $0x23] ss:$4 sm:$0xff] }
  0x15   :  { %5284 = vmatpush3.msk.msra.mxu0 %vm129_vm1, %v64_v1  ;;  %5313 = vmatpush3.msk.msra.mxu1 %vm129_vm1, %v64_v1  ;;  %v4831_v7 = vld [vmem:[%s7152_s0 + $0x41] ss:$4 sm:$0xff]  ;;  %v6248_v8 = vld [vmem:[%s7152_s0 + $0x43] ss:$4 sm:$0xff]  ;;  %v29_v21 = vld [vmem:[%s7152_s0] ss:$4 sm:$0xff] }
  0x16   :  { %5286 = vmatmul.mubr.msk.f32.vlgmr.msra.gmra.mrb[0].mxu0 %vm101_vm2, %v4829_v2  ;;  %5315 = vmatmul.mubr.msk.f32.vlgmr.msra.gmra.mrb[0].mxu1 %vm101_vm2, %v6209_v3  ;;  %v4832_v9 = vld [vmem:[%s7152_s0 + $0x61] ss:$4 sm:$0xff]  ;;  %v6265_v10 = vld [vmem:[%s7152_s0 + $0x63] ss:$4 sm:$0xff]  ;;  %v4820_v22 = vld [vmem:[%s7152_s0 + $0x2] ss:$4 sm:$0xff] }
  0x17   :  { %5341 = vmatprep.subr.mxu0 %v6157_v0  ;;  %5370 = vmatprep.subr.mxu1 %v6157_v0  ;;  %v4833_v11 = vld [vmem:[%s7152_s0 + $0x81] ss:$4 sm:$0xff]  ;;  %v6280_v12 = vld [vmem:[%s7152_s0 + $0x83] ss:$4 sm:$0xff]  ;;  %v657_v23 = vld [vmem:[%s7153_s1 + $0x10] sm:$0x1] }
  0x18   :  { %5342 = vmatpush3.msk.msra.mxu0 %vm129_vm1, %v28_v4  ;;  %5371 = vmatpush3.msk.msra.mxu1 %vm129_vm1, %v28_v4  ;;  %v4834_v13 = vld [vmem:[%s7152_s0 + $0xa1] ss:$4 sm:$0xff]  ;;  %v6295_v14 = vld [vmem:[%s7152_s0 + $0xa3] ss:$4 sm:$0xff]  ;;  %v4812_v24 = vld [vmem:[%s7152_s0 + $0x20] ss:$4 sm:$0xff] }
  0x19   :  { %5288 = vmatprep.mubr.msk.f32.mxu0 %vm6158_vm0, %v6157_v0  ;;  %5317 = vmatprep.mubr.msk.f32.mxu1 %vm6158_vm0, %v6157_v0  ;;  %v4835_v15 = vld [vmem:[%s7152_s0 + $0xc1] ss:$4 sm:$0xff]  ;;  %v6310_v16 = vld [vmem:[%s7152_s0 + $0xc3] ss:$4 sm:$0xff]  ;;  %v4821_v25 = vld [vmem:[%s7152_s0 + $0x22] ss:$4 sm:$0xff] }
  0x1a   :  { %5289 = vmatmul.mubr.msk.f32.gmra.mrb[2].mxu0 %vm101_vm2, %v4830_v5  ;;  %5318 = vmatmul.mubr.msk.f32.gmra.mrb[2].mxu1 %vm101_vm2, %v6227_v6  ;;  %v4836_v17 = vld [vmem:[%s7152_s0 + $0xe1] ss:$4 sm:$0xff]  ;;  %v6325_v18 = vld [vmem:[%s7152_s0 + $0xe3] ss:$4 sm:$0xff]  ;;  %v4813_v26 = vld [vmem:[%s7152_s0 + $0x40] ss:$4 sm:$0xff] }
  0x1b   :  { %5291 = vmatprep.mubr.msk.f32.mxu0 %vm6158_vm0, %v6157_v0  ;;  %5320 = vmatprep.mubr.msk.f32.mxu1 %vm6158_vm0, %v6157_v0  ;;  %v4837_v19 = vld [vmem:[%s7152_s0 + $0x101] ss:$4 sm:$0x3f]  ;;  %v6340_v20 = vld [vmem:[%s7152_s0 + $0x103] ss:$4 sm:$0x3f] }
  0x1c   :  { %5399 = vmatprep.subr.mxu0 %v6157_v0  ;;  %5428 = vmatprep.subr.mxu1 %v6157_v0  ;;  %v4822_v27 = vld [vmem:[%s7152_s0 + $0x42] ss:$4 sm:$0xff]  ;;  %v4814_v28 = vld [vmem:[%s7152_s0 + $0x60] ss:$4 sm:$0xff]  ;;  %v6582_v50 = vld [vmem:[%s7152_s0 + $0x5] ss:$4 sm:$0xff] }
  0x1d   :  { %v4823_v29 = vld [vmem:[%s7152_s0 + $0x62] ss:$4 sm:$0xff]  ;;  %v4815_v30 = vld [vmem:[%s7152_s0 + $0x80] ss:$4 sm:$0xff]  ;;  %v6596_v52 = vld [vmem:[%s7152_s0 + $0x25] ss:$4 sm:$0xff] }
  0x1e   :  { %5292 = vmatmul.mubr.msk.f32.gmra.mrb[4].mxu0 %vm101_vm2, %v4831_v7  ;;  %5321 = vmatmul.mubr.msk.f32.gmra.mrb[4].mxu1 %vm101_vm2, %v6248_v8  ;;  %v4824_v31 = vld [vmem:[%s7152_s0 + $0x82] ss:$4 sm:$0xff]  ;;  %v4816_v32 = vld [vmem:[%s7152_s0 + $0xa0] ss:$4 sm:$0xff]  ;;  %v6615_v53 = vld [vmem:[%s7152_s0 + $0x45] ss:$4 sm:$0xff] }
  0x1f   :  { %5294 = vmatprep.mubr.msk.f32.mxu0 %vm6158_vm0, %v6157_v0  ;;  %5323 = vmatprep.mubr.msk.f32.mxu1 %vm6158_vm0, %v6157_v0  ;;  %v4825_v33 = vld [vmem:[%s7152_s0 + $0xa2] ss:$4 sm:$0xff]  ;;  %v4817_v34 = vld [vmem:[%s7152_s0 + $0xc0] ss:$4 sm:$0xff]  ;;  %v6628_v54 = vld [vmem:[%s7152_s0 + $0x65] ss:$4 sm:$0xff] }
  0x20   :  { %v4826_v35 = vld [vmem:[%s7152_s0 + $0xc2] ss:$4 sm:$0xff]  ;;  %v4818_v36 = vld [vmem:[%s7152_s0 + $0xe0] ss:$4 sm:$0xff]  ;;  %v6641_v55 = vld [vmem:[%s7152_s0 + $0x85] ss:$4 sm:$0xff] }
  0x21   :  { %v4827_v37 = vld [vmem:[%s7152_s0 + $0xe2] ss:$4 sm:$0xff]  ;;  %v4819_v38 = vld [vmem:[%s7152_s0 + $0x100] ss:$4 sm:$0x3f]  ;;  %vm1898_vm3 = vcmask 1043456  }
  0x22   :  { %5295 = vmatmul.mubr.msk.f32.gmra.mrb[6].mxu0 %vm101_vm2, %v4832_v9  ;;  %5324 = vmatmul.mubr.msk.f32.gmra.mrb[6].mxu1 %vm101_vm2, %v6265_v10  ;;  %v4828_v39 = vld [vmem:[%s7152_s0 + $0x102] ss:$4 sm:$0x3f]  ;;  %v6467_v40 = vld [vmem:[%s7152_s0 + $0x4] ss:$4 sm:$0xff]  ;;  %vm1864_vm4 = vcmask 31744  }
  0x23   :  { %5297 = vmatprep.mubr.msk.f32.mxu0 %vm6158_vm0, %v6157_v0  ;;  %5326 = vmatprep.mubr.msk.f32.mxu1 %vm6158_vm0, %v6157_v0  ;;  %v944_v41 = vld [vmem:[%s7153_s1 + $0x18] sm:$0x1]  ;;  %v1231_v51 = vld [vmem:[%s7153_s1 + $0x20] sm:$0x1]  ;;  %v6654_v56 = vld [vmem:[%s7152_s0 + $0xa5] ss:$4 sm:$0xff] }
  0x24   :  { %v6480_v42 = vld [vmem:[%s7152_s0 + $0x24] ss:$4 sm:$0xff]  ;;  %v6667_v57 = vld [vmem:[%s7152_s0 + $0xc5] ss:$4 sm:$0xff]  ;;  %v4945_v60 = vld [vmem:[%s7152_s0 + $0x6] ss:$4 sm:$0xff] }
  0x25   :  { %v6498_v43 = vld [vmem:[%s7152_s0 + $0x44] ss:$4 sm:$0xff]  ;;  %v6680_v58 = vld [vmem:[%s7152_s0 + $0xe5] ss:$4 sm:$0xff]  ;;  %v4946_v62 = vld [vmem:[%s7152_s0 + $0x26] ss:$4 sm:$0xff] }
  0x26   :  { %5298 = vmatmul.mubr.msk.f32.gmra.mrb[8].mxu0 %vm101_vm2, %v4833_v11  ;;  %5327 = vmatmul.mubr.msk.f32.gmra.mrb[8].mxu1 %vm101_vm2, %v6280_v12  ;;  %v6510_v44 = vld [vmem:[%s7152_s0 + $0x64] ss:$4 sm:$0xff]  ;;  %v6693_v59 = vld [vmem:[%s7152_s0 + $0x105] ss:$4 sm:$0x3f]  ;;  %vm1873_vm5 = vcmask 29696  }
  0x27   :  { %5300 = vmatprep.mubr.msk.f32.mxu0 %vm6158_vm0, %v6157_v0  ;;  %5329 = vmatprep.mubr.msk.f32.mxu1 %vm6158_vm0, %v6157_v0  ;;  %v6522_v45 = vld [vmem:[%s7152_s0 + $0x84] ss:$4 sm:$0xff]  ;;  %v4947_v63 = vld [vmem:[%s7152_s0 + $0x46] ss:$4 sm:$0xff]  ;;  %v4974_v7 = vld [vmem:[%s7152_s0 + $0x7] ss:$4 sm:$0xff] }
  0x28   :  { %v6534_v46 = vld [vmem:[%s7152_s0 + $0xa4] ss:$4 sm:$0xff]  ;;  %v4948_v1 = vld [vmem:[%s7152_s0 + $0x66] ss:$4 sm:$0xff]  ;;  %v4976_v9 = vld [vmem:[%s7152_s0 + $0x47] ss:$4 sm:$0xff] }
  0x29   :  { %v6546_v47 = vld [vmem:[%s7152_s0 + $0xc4] ss:$4 sm:$0xff]  ;;  %v4949_v2 = vld [vmem:[%s7152_s0 + $0x86] ss:$4 sm:$0xff]  ;;  %v4978_v11 = vld [vmem:[%s7152_s0 + $0x87] ss:$4 sm:$0xff] }
  0x2a   :  { %5301 = vmatmul.mubr.msk.f32.gmra.mrb[10].mxu0 %vm101_vm2, %v4834_v13  ;;  %5330 = vmatmul.mubr.msk.f32.gmra.mrb[10].mxu1 %vm101_vm2, %v6295_v14  ;;  %v6558_v48 = vld [vmem:[%s7152_s0 + $0xe4] ss:$4 sm:$0xff]  ;;  %v4951_v4 = vld [vmem:[%s7152_s0 + $0xc6] ss:$4 sm:$0xff]  ;;  %v4980_v13 = vld [vmem:[%s7152_s0 + $0xc7] ss:$4 sm:$0xff] }
  0x2b   :  { %5303 = vmatprep.mubr.msk.f32.mxu0 %vm6158_vm0, %v6157_v0  ;;  %5332 = vmatprep.mubr.msk.f32.mxu1 %vm6158_vm0, %v6157_v0  ;;  %v6570_v49 = vld [vmem:[%s7152_s0 + $0x104] ss:$4 sm:$0x3f]  ;;  %v4952_v5 = vld [vmem:[%s7152_s0 + $0xe6] ss:$4 sm:$0xff]  ;;  %vm3248_vm6 = vcmask 64512  }
  0x2c   :  { %v1518_v61 = vld [vmem:[%s7153_s1 + $0x28] sm:$0x1]  ;;  %vm4010_vm7 = vcmask 130048   ;;  %vm4250_vm8 = vcmask 1045504   ;;  %vm6160_vm9 = vmmov 1   ;;  %vm4246_vm11 = vcmask 244736  }
  0x2d   :  { %vm7102_vm10 = vmpackc.low %vm4250_vm8, %vm6160_vm9 }
  0x2e   :  { %5304 = vmatmul.mubr.msk.f32.gmra.mrb[12].mxu0 %vm101_vm2, %v4835_v15  ;;  %5333 = vmatmul.mubr.msk.f32.gmra.mrb[12].mxu1 %vm101_vm2, %v6310_v16  ;;  %v4982_v15 = vld [vmem:[%s7152_s0 + $0x107] ss:$4 sm:$0x3f] }
  0x2f   :  { %5306 = vmatprep.mubr.msk.f32.mxu0 %vm6158_vm0, %v6157_v0  ;;  %5335 = vmatprep.mubr.msk.f32.mxu1 %vm6158_vm0, %v6157_v0 }
  0x32   :  { %5307 = vmatmul.mubr.msk.f32.gmra.mrb[14].mxu0 %vm101_vm2, %v4836_v17  ;;  %5336 = vmatmul.mubr.msk.f32.gmra.mrb[14].mxu1 %vm101_vm2, %v6325_v18  ;;  %v6894_v17 = vld [vmem:[%s7153_s1 + $0x30] sm:$0xf] }
  0x33   :  { %5309 = vmatprep.mubr.msk.f32.mxu0 %vm6158_vm0, %v6157_v0  ;;  %5338 = vmatprep.mubr.msk.f32.mxu1 %vm6158_vm0, %v6157_v0 }
  0x36   :  { %5310 = vmatmul.mubr.msk.f32.gmra.mrb[16].mxu0 %vm101_vm2, %v4837_v19  ;;  %5339 = vmatmul.mubr.msk.f32.gmra.mrb[16].mxu1 %vm101_vm2, %v6340_v20 }
  0x37   :  { %5343 = vmatprep.mubr.msk.f32.mxu0 %vm6158_vm0, %v6157_v0  ;;  %5372 = vmatprep.mubr.msk.f32.mxu1 %vm6158_vm0, %v6157_v0 }
  0x3a   :  { %5344 = vmatmul.mubr.msk.f32.vlgmr.msra.gmra.mrb[0].mxu0 %vm101_vm2, %v29_v21  ;;  %5373 = vmatmul.mubr.msk.f32.vlgmr.msra.gmra.mrb[0].mxu1 %vm101_vm2, %v4820_v22 }
  0x3b   :  { %5400 = vmatpush3.msk.msra.mxu0 %vm129_vm1, %v657_v23  ;;  %5429 = vmatpush3.msk.msra.mxu1 %vm129_vm1, %v657_v23 }
  0x3c   :  { %5346 = vmatprep.mubr.msk.f32.mxu0 %vm6158_vm0, %v6157_v0  ;;  %5375 = vmatprep.mubr.msk.f32.mxu1 %vm6158_vm0, %v6157_v0 }
  0x3d   :  { %5457 = vmatprep.subr.mxu0 %v6157_v0  ;;  %5486 = vmatprep.subr.mxu1 %v6157_v0 }
  0x3e   :  { %5347 = vmatmul.mubr.msk.f32.gmra.mrb[2].mxu0 %vm101_vm2, %v4812_v24  ;;  %5376 = vmatmul.mubr.msk.f32.gmra.mrb[2].mxu1 %vm101_vm2, %v4821_v25 }
  0x3f   :  { %5349 = vmatprep.mubr.msk.f32.mxu0 %vm6158_vm0, %v6157_v0  ;;  %5378 = vmatprep.mubr.msk.f32.mxu1 %vm6158_vm0, %v6157_v0 }
  0x42   :  { %5350 = vmatmul.mubr.msk.f32.gmra.mrb[4].mxu0 %vm101_vm2, %v4813_v26  ;;  %5379 = vmatmul.mubr.msk.f32.gmra.mrb[4].mxu1 %vm101_vm2, %v4822_v27 }
  0x43   :  { %5352 = vmatprep.mubr.msk.f32.mxu0 %vm6158_vm0, %v6157_v0  ;;  %5381 = vmatprep.mubr.msk.f32.mxu1 %vm6158_vm0, %v6157_v0 }
  0x46   :  { %5353 = vmatmul.mubr.msk.f32.gmra.mrb[6].mxu0 %vm101_vm2, %v4814_v28  ;;  %5382 = vmatmul.mubr.msk.f32.gmra.mrb[6].mxu1 %vm101_vm2, %v4823_v29 }
  0x47   :  { %5355 = vmatprep.mubr.msk.f32.mxu0 %vm6158_vm0, %v6157_v0  ;;  %5384 = vmatprep.mubr.msk.f32.mxu1 %vm6158_vm0, %v6157_v0 }
  0x4a   :  { %5356 = vmatmul.mubr.msk.f32.gmra.mrb[8].mxu0 %vm101_vm2, %v4815_v30  ;;  %5385 = vmatmul.mubr.msk.f32.gmra.mrb[8].mxu1 %vm101_vm2, %v4824_v31 }
  0x4b   :  { %5358 = vmatprep.mubr.msk.f32.mxu0 %vm6158_vm0, %v6157_v0  ;;  %5387 = vmatprep.mubr.msk.f32.mxu1 %vm6158_vm0, %v6157_v0 }
  0x4e   :  { %5359 = vmatmul.mubr.msk.f32.gmra.mrb[10].mxu0 %vm101_vm2, %v4816_v32  ;;  %5388 = vmatmul.mubr.msk.f32.gmra.mrb[10].mxu1 %vm101_vm2, %v4825_v33 }
  0x4f   :  { %5361 = vmatprep.mubr.msk.f32.mxu0 %vm6158_vm0, %v6157_v0  ;;  %5390 = vmatprep.mubr.msk.f32.mxu1 %vm6158_vm0, %v6157_v0 }
  0x52   :  { %5362 = vmatmul.mubr.msk.f32.gmra.mrb[12].mxu0 %vm101_vm2, %v4817_v34  ;;  %5391 = vmatmul.mubr.msk.f32.gmra.mrb[12].mxu1 %vm101_vm2, %v4826_v35 }
  0x53   :  { %5364 = vmatprep.mubr.msk.f32.mxu0 %vm6158_vm0, %v6157_v0  ;;  %5393 = vmatprep.mubr.msk.f32.mxu1 %vm6158_vm0, %v6157_v0 }
  0x56   :  { %5365 = vmatmul.mubr.msk.f32.gmra.mrb[14].mxu0 %vm101_vm2, %v4818_v36  ;;  %5394 = vmatmul.mubr.msk.f32.gmra.mrb[14].mxu1 %vm101_vm2, %v4827_v37 }
  0x57   :  { %5367 = vmatprep.mubr.msk.f32.mxu0 %vm6158_vm0, %v6157_v0  ;;  %5396 = vmatprep.mubr.msk.f32.mxu1 %vm6158_vm0, %v6157_v0 }
  0x5a   :  { %5368 = vmatmul.mubr.msk.f32.gmra.mrb[16].mxu0 %vm101_vm2, %v4819_v38  ;;  %5397 = vmatmul.mubr.msk.f32.gmra.mrb[16].mxu1 %vm101_vm2, %v4828_v39 }
  0x5b   :  { %5401 = vmatprep.mubr.msk.f32.mxu0 %vm6158_vm0, %v6157_v0  ;;  %5430 = vmatprep.mubr.msk.f32.mxu1 %vm6158_vm0, %v6157_v0 }
  0x5e   :  { %5402 = vmatmul.mubr.msk.f32.vlgmr.msra.gmra.mrb[0].mxu0 %vm101_vm2, %v4820_v22  ;;  %5431 = vmatmul.mubr.msk.f32.vlgmr.msra.gmra.mrb[0].mxu1 %vm101_vm2, %v6467_v40 }
  0x5f   :  { %5458 = vmatpush3.msk.msra.mxu0 %vm129_vm1, %v944_v41  ;;  %5487 = vmatpush3.msk.msra.mxu1 %vm129_vm1, %v944_v41 }
  0x60   :  { %5404 = vmatprep.mubr.msk.f32.mxu0 %vm6158_vm0, %v6157_v0  ;;  %5433 = vmatprep.mubr.msk.f32.mxu1 %vm6158_vm0, %v6157_v0 }
  0x61   :  { %5515 = vmatprep.subr.mxu0 %v6157_v0  ;;  %5544 = vmatprep.subr.mxu1 %v6157_v0 }
  0x62   :  { %5405 = vmatmul.mubr.msk.f32.gmra.mrb[2].mxu0 %vm101_vm2, %v4821_v25  ;;  %5434 = vmatmul.mubr.msk.f32.gmra.mrb[2].mxu1 %vm101_vm2, %v6480_v42 }
  0x63   :  { %5407 = vmatprep.mubr.msk.f32.mxu0 %vm6158_vm0, %v6157_v0  ;;  %5436 = vmatprep.mubr.msk.f32.mxu1 %vm6158_vm0, %v6157_v0 }
  0x66   :  { %5408 = vmatmul.mubr.msk.f32.gmra.mrb[4].mxu0 %vm101_vm2, %v4822_v27  ;;  %5437 = vmatmul.mubr.msk.f32.gmra.mrb[4].mxu1 %vm101_vm2, %v6498_v43 }
  0x67   :  { %5410 = vmatprep.mubr.msk.f32.mxu0 %vm6158_vm0, %v6157_v0  ;;  %5439 = vmatprep.mubr.msk.f32.mxu1 %vm6158_vm0, %v6157_v0 }
  0x6a   :  { %5411 = vmatmul.mubr.msk.f32.gmra.mrb[6].mxu0 %vm101_vm2, %v4823_v29  ;;  %5440 = vmatmul.mubr.msk.f32.gmra.mrb[6].mxu1 %vm101_vm2, %v6510_v44 }
  0x6b   :  { %5413 = vmatprep.mubr.msk.f32.mxu0 %vm6158_vm0, %v6157_v0  ;;  %5442 = vmatprep.mubr.msk.f32.mxu1 %vm6158_vm0, %v6157_v0 }
  0x6e   :  { %5414 = vmatmul.mubr.msk.f32.gmra.mrb[8].mxu0 %vm101_vm2, %v4824_v31  ;;  %5443 = vmatmul.mubr.msk.f32.gmra.mrb[8].mxu1 %vm101_vm2, %v6522_v45 }
  0x6f   :  { %5416 = vmatprep.mubr.msk.f32.mxu0 %vm6158_vm0, %v6157_v0  ;;  %5445 = vmatprep.mubr.msk.f32.mxu1 %vm6158_vm0, %v6157_v0 }
  0x72   :  { %5417 = vmatmul.mubr.msk.f32.gmra.mrb[10].mxu0 %vm101_vm2, %v4825_v33  ;;  %5446 = vmatmul.mubr.msk.f32.gmra.mrb[10].mxu1 %vm101_vm2, %v6534_v46 }
  0x73   :  { %5419 = vmatprep.mubr.msk.f32.mxu0 %vm6158_vm0, %v6157_v0  ;;  %5448 = vmatprep.mubr.msk.f32.mxu1 %vm6158_vm0, %v6157_v0 }
  0x76   :  { %5420 = vmatmul.mubr.msk.f32.gmra.mrb[12].mxu0 %vm101_vm2, %v4826_v35  ;;  %5449 = vmatmul.mubr.msk.f32.gmra.mrb[12].mxu1 %vm101_vm2, %v6546_v47 }
  0x77   :  { %5422 = vmatprep.mubr.msk.f32.mxu0 %vm6158_vm0, %v6157_v0  ;;  %5451 = vmatprep.mubr.msk.f32.mxu1 %vm6158_vm0, %v6157_v0 }
  0x7a   :  { %5423 = vmatmul.mubr.msk.f32.gmra.mrb[14].mxu0 %vm101_vm2, %v4827_v37  ;;  %5452 = vmatmul.mubr.msk.f32.gmra.mrb[14].mxu1 %vm101_vm2, %v6558_v48 }
  0x7b   :  { %5425 = vmatprep.mubr.msk.f32.mxu0 %vm6158_vm0, %v6157_v0  ;;  %5454 = vmatprep.mubr.msk.f32.mxu1 %vm6158_vm0, %v6157_v0 }
  0x7e   :  { %5426 = vmatmul.mubr.msk.f32.gmra.mrb[16].mxu0 %vm101_vm2, %v4828_v39  ;;  %5455 = vmatmul.mubr.msk.f32.gmra.mrb[16].mxu1 %vm101_vm2, %v6570_v49 }
  0x7f   :  { %5459 = vmatprep.mubr.msk.f32.mxu0 %vm6158_vm0, %v6157_v0  ;;  %5488 = vmatprep.mubr.msk.f32.mxu1 %vm6158_vm0, %v6157_v0 }
  0x82   :  { %5460 = vmatmul.mubr.msk.f32.vlgmr.msra.gmra.mrb[0].mxu0 %vm101_vm2, %v6209_v3  ;;  %5489 = vmatmul.mubr.msk.f32.vlgmr.msra.gmra.mrb[0].mxu1 %vm101_vm2, %v6582_v50  ;;  %v4950_v3 = vld [vmem:[%s7152_s0 + $0xa6] ss:$4 sm:$0xff] }
  0x83   :  { %5516 = vmatpush3.msk.msra.mxu0 %vm129_vm1, %v1231_v51  ;;  %5545 = vmatpush3.msk.msra.mxu1 %vm129_vm1, %v1231_v51 }
  0x84   :  { %5462 = vmatprep.mubr.msk.f32.mxu0 %vm6158_vm0, %v6157_v0  ;;  %5491 = vmatprep.mubr.msk.f32.mxu1 %vm6158_vm0, %v6157_v0 }
  0x85   :  { %5573 = vmatprep.subr.mxu0 %v6157_v0  ;;  %5602 = vmatprep.subr.mxu1 %v6157_v0 }
  0x86   :  { %5463 = vmatmul.mubr.msk.f32.gmra.mrb[2].mxu0 %vm101_vm2, %v6227_v6  ;;  %5492 = vmatmul.mubr.msk.f32.gmra.mrb[2].mxu1 %vm101_vm2, %v6596_v52  ;;  %v4953_v6 = vld [vmem:[%s7152_s0 + $0x106] ss:$4 sm:$0x3f] }
  0x87   :  { %5465 = vmatprep.mubr.msk.f32.mxu0 %vm6158_vm0, %v6157_v0  ;;  %5494 = vmatprep.mubr.msk.f32.mxu1 %vm6158_vm0, %v6157_v0 }
  0x8a   :  { %5466 = vmatmul.mubr.msk.f32.gmra.mrb[4].mxu0 %vm101_vm2, %v6248_v8  ;;  %5495 = vmatmul.mubr.msk.f32.gmra.mrb[4].mxu1 %vm101_vm2, %v6615_v53  ;;  %v4975_v8 = vld [vmem:[%s7152_s0 + $0x27] ss:$4 sm:$0xff] }
  0x8b   :  { %5468 = vmatprep.mubr.msk.f32.mxu0 %vm6158_vm0, %v6157_v0  ;;  %5497 = vmatprep.mubr.msk.f32.mxu1 %vm6158_vm0, %v6157_v0 }
  0x8e   :  { %5469 = vmatmul.mubr.msk.f32.gmra.mrb[6].mxu0 %vm101_vm2, %v6265_v10  ;;  %5498 = vmatmul.mubr.msk.f32.gmra.mrb[6].mxu1 %vm101_vm2, %v6628_v54  ;;  %v4977_v10 = vld [vmem:[%s7152_s0 + $0x67] ss:$4 sm:$0xff] }
  0x8f   :  { %5471 = vmatprep.mubr.msk.f32.mxu0 %vm6158_vm0, %v6157_v0  ;;  %5500 = vmatprep.mubr.msk.f32.mxu1 %vm6158_vm0, %v6157_v0 }
  0x92   :  { %5472 = vmatmul.mubr.msk.f32.gmra.mrb[8].mxu0 %vm101_vm2, %v6280_v12  ;;  %5501 = vmatmul.mubr.msk.f32.gmra.mrb[8].mxu1 %vm101_vm2, %v6641_v55  ;;  %v4979_v12 = vld [vmem:[%s7152_s0 + $0xa7] ss:$4 sm:$0xff] }
  0x93   :  { %5474 = vmatprep.mubr.msk.f32.mxu0 %vm6158_vm0, %v6157_v0  ;;  %5503 = vmatprep.mubr.msk.f32.mxu1 %vm6158_vm0, %v6157_v0 }
  0x96   :  { %5475 = vmatmul.mubr.msk.f32.gmra.mrb[10].mxu0 %vm101_vm2, %v6295_v14  ;;  %5504 = vmatmul.mubr.msk.f32.gmra.mrb[10].mxu1 %vm101_vm2, %v6654_v56  ;;  %v4981_v14 = vld [vmem:[%s7152_s0 + $0xe7] ss:$4 sm:$0xff] }
  0x97   :  { %5477 = vmatprep.mubr.msk.f32.mxu0 %vm6158_vm0, %v6157_v0  ;;  %5506 = vmatprep.mubr.msk.f32.mxu1 %vm6158_vm0, %v6157_v0 }
  0x9a   :  { %5478 = vmatmul.mubr.msk.f32.gmra.mrb[12].mxu0 %vm101_vm2, %v6310_v16  ;;  %5507 = vmatmul.mubr.msk.f32.gmra.mrb[12].mxu1 %vm101_vm2, %v6667_v57  ;;  %v1883_v16 = vld [vmem:[%s7153_s1 + $0x38] sm:$0xf] }
  0x9b   :  { %5480 = vmatprep.mubr.msk.f32.mxu0 %vm6158_vm0, %v6157_v0  ;;  %5509 = vmatprep.mubr.msk.f32.mxu1 %vm6158_vm0, %v6157_v0 }
  0x9e   :  { %5481 = vmatmul.mubr.msk.f32.gmra.mrb[14].mxu0 %vm101_vm2, %v6325_v18  ;;  %5510 = vmatmul.mubr.msk.f32.gmra.mrb[14].mxu1 %vm101_vm2, %v6680_v58 }
  0x9f   :  { %5483 = vmatprep.mubr.msk.f32.mxu0 %vm6158_vm0, %v6157_v0  ;;  %5512 = vmatprep.mubr.msk.f32.mxu1 %vm6158_vm0, %v6157_v0 }
  0xa2   :  { %5484 = vmatmul.mubr.msk.f32.gmra.mrb[16].mxu0 %vm101_vm2, %v6340_v20  ;;  %5513 = vmatmul.mubr.msk.f32.gmra.mrb[16].mxu1 %vm101_vm2, %v6693_v59  ;;  %v6903_v20 = vld [vmem:[%s7153_s1 + $0x98] ss:$0 sm:$0xff] }
  0xa3   :  { %5517 = vmatprep.mubr.msk.f32.mxu0 %vm6158_vm0, %v6157_v0  ;;  %5546 = vmatprep.mubr.msk.f32.mxu1 %vm6158_vm0, %v6157_v0 }
  0xa6   :  { %5518 = vmatmul.mubr.msk.f32.vlgmr.msra.gmra.mrb[0].mxu0 %vm101_vm2, %v6467_v40  ;;  %5547 = vmatmul.mubr.msk.f32.vlgmr.msra.gmra.mrb[0].mxu1 %vm101_vm2, %v4945_v60 }
  0xa7   :  { %5574 = vmatpush3.msk.msra.mxu0 %vm129_vm1, %v1518_v61  ;;  %5603 = vmatpush3.msk.msra.mxu1 %vm129_vm1, %v1518_v61 }
  0xa8   :  { %5520 = vmatprep.mubr.msk.f32.mxu0 %vm6158_vm0, %v6157_v0  ;;  %5549 = vmatprep.mubr.msk.f32.mxu1 %vm6158_vm0, %v6157_v0 }
  0xa9   :  { %5631 = vmatprep.subr.msk.mxu0 %vm1898_vm3, %v1883_v16  ;;  %5636 = vmatprep.subr.msk.mxu1 %vm1898_vm3, %v1883_v16 }
  0xaa   :  { %5521 = vmatmul.mubr.msk.f32.gmra.mrb[2].mxu0 %vm101_vm2, %v6480_v42  ;;  %5550 = vmatmul.mubr.msk.f32.gmra.mrb[2].mxu1 %vm101_vm2, %v4946_v62 }
  0xab   :  { %5523 = vmatprep.mubr.msk.f32.mxu0 %vm6158_vm0, %v6157_v0  ;;  %5552 = vmatprep.mubr.msk.f32.mxu1 %vm6158_vm0, %v6157_v0 }
  0xae   :  { %5524 = vmatmul.mubr.msk.f32.gmra.mrb[4].mxu0 %vm101_vm2, %v6498_v43  ;;  %5553 = vmatmul.mubr.msk.f32.gmra.mrb[4].mxu1 %vm101_vm2, %v4947_v63 }
  0xaf   :  { %5526 = vmatprep.mubr.msk.f32.mxu0 %vm6158_vm0, %v6157_v0  ;;  %5555 = vmatprep.mubr.msk.f32.mxu1 %vm6158_vm0, %v6157_v0 }
  0xb2   :  { %5527 = vmatmul.mubr.msk.f32.gmra.mrb[6].mxu0 %vm101_vm2, %v6510_v44  ;;  %5556 = vmatmul.mubr.msk.f32.gmra.mrb[6].mxu1 %vm101_vm2, %v4948_v1 }
  0xb3   :  { %5529 = vmatprep.mubr.msk.f32.mxu0 %vm6158_vm0, %v6157_v0  ;;  %5558 = vmatprep.mubr.msk.f32.mxu1 %vm6158_vm0, %v6157_v0 }
  0xb6   :  { %5530 = vmatmul.mubr.msk.f32.gmra.mrb[8].mxu0 %vm101_vm2, %v6522_v45  ;;  %5559 = vmatmul.mubr.msk.f32.gmra.mrb[8].mxu1 %vm101_vm2, %v4949_v2 }
  0xb7   :  { %5532 = vmatprep.mubr.msk.f32.mxu0 %vm6158_vm0, %v6157_v0  ;;  %5561 = vmatprep.mubr.msk.f32.mxu1 %vm6158_vm0, %v6157_v0 }
  0xba   :  { %5533 = vmatmul.mubr.msk.f32.gmra.mrb[10].mxu0 %vm101_vm2, %v6534_v46  ;;  %5562 = vmatmul.mubr.msk.f32.gmra.mrb[10].mxu1 %vm101_vm2, %v4950_v3 }
  0xbb   :  { %5535 = vmatprep.mubr.msk.f32.mxu0 %vm6158_vm0, %v6157_v0  ;;  %5564 = vmatprep.mubr.msk.f32.mxu1 %vm6158_vm0, %v6157_v0 }
  0xbe   :  { %5536 = vmatmul.mubr.msk.f32.gmra.mrb[12].mxu0 %vm101_vm2, %v6546_v47  ;;  %5565 = vmatmul.mubr.msk.f32.gmra.mrb[12].mxu1 %vm101_vm2, %v4951_v4 }
  0xbf   :  { %5538 = vmatprep.mubr.msk.f32.mxu0 %vm6158_vm0, %v6157_v0  ;;  %5567 = vmatprep.mubr.msk.f32.mxu1 %vm6158_vm0, %v6157_v0 }
  0xc2   :  { %5539 = vmatmul.mubr.msk.f32.gmra.mrb[14].mxu0 %vm101_vm2, %v6558_v48  ;;  %5568 = vmatmul.mubr.msk.f32.gmra.mrb[14].mxu1 %vm101_vm2, %v4952_v5 }
  0xc3   :  { %5541 = vmatprep.mubr.msk.f32.mxu0 %vm6158_vm0, %v6157_v0  ;;  %5570 = vmatprep.mubr.msk.f32.mxu1 %vm6158_vm0, %v6157_v0 }
  0xc6   :  { %5542 = vmatmul.mubr.msk.f32.gmra.mrb[16].mxu0 %vm101_vm2, %v6570_v49  ;;  %5571 = vmatmul.mubr.msk.f32.gmra.mrb[16].mxu1 %vm101_vm2, %v4953_v6 }
  0xc7   :  { %5575 = vmatprep.mubr.msk.f32.mxu0 %vm6158_vm0, %v6157_v0  ;;  %5604 = vmatprep.mubr.msk.f32.mxu1 %vm6158_vm0, %v6157_v0 }
  0xca   :  { %5576 = vmatmul.mubr.msk.f32.vlgmr.msra.gmra.mrb[0].mxu0 %vm101_vm2, %v6582_v50  ;;  %5605 = vmatmul.mubr.msk.f32.vlgmr.msra.gmra.mrb[0].mxu1 %vm101_vm2, %v4974_v7 }
  0xcb   :  { %5578 = vmatprep.mubr.msk.f32.mxu0 %vm6158_vm0, %v6157_v0  ;;  %5607 = vmatprep.mubr.msk.f32.mxu1 %vm6158_vm0, %v6157_v0 }
  0xcc   :  { %5632 = vmatpush3.msk.msra.mxu0 %vm1898_vm3, %v1883_v16  ;;  %5637 = vmatpush3.msk.msra.mxu1 %vm1898_vm3, %v1883_v16 }
  0xcd   :  { %5641 = vmatprep.subr.msk.mxu0 %vm1898_vm3, %v6894_v17  ;;  %5646 = vmatprep.subr.msk.mxu1 %vm1898_vm3, %v6894_v17 }
  0xce   :  { %5579 = vmatmul.mubr.msk.f32.gmra.mrb[2].mxu0 %vm101_vm2, %v6596_v52  ;;  %5608 = vmatmul.mubr.msk.f32.gmra.mrb[2].mxu1 %vm101_vm2, %v4975_v8 }
  0xcf   :  { %5581 = vmatprep.mubr.msk.f32.mxu0 %vm6158_vm0, %v6157_v0  ;;  %5610 = vmatprep.mubr.msk.f32.mxu1 %vm6158_vm0, %v6157_v0 }
  0xd2   :  { %5582 = vmatmul.mubr.msk.f32.gmra.mrb[4].mxu0 %vm101_vm2, %v6615_v53  ;;  %5611 = vmatmul.mubr.msk.f32.gmra.mrb[4].mxu1 %vm101_vm2, %v4976_v9 }
  0xd3   :  { %5584 = vmatprep.mubr.msk.f32.mxu0 %vm6158_vm0, %v6157_v0  ;;  %5613 = vmatprep.mubr.msk.f32.mxu1 %vm6158_vm0, %v6157_v0 }
  0xd6   :  { %5585 = vmatmul.mubr.msk.f32.gmra.mrb[6].mxu0 %vm101_vm2, %v6628_v54  ;;  %5614 = vmatmul.mubr.msk.f32.gmra.mrb[6].mxu1 %vm101_vm2, %v4977_v10 }
  0xd7   :  { %5587 = vmatprep.mubr.msk.f32.mxu0 %vm6158_vm0, %v6157_v0  ;;  %5616 = vmatprep.mubr.msk.f32.mxu1 %vm6158_vm0, %v6157_v0 }
  0xda   :  { %5588 = vmatmul.mubr.msk.f32.gmra.mrb[8].mxu0 %vm101_vm2, %v6641_v55  ;;  %5617 = vmatmul.mubr.msk.f32.gmra.mrb[8].mxu1 %vm101_vm2, %v4978_v11 }
  0xdb   :  { %5590 = vmatprep.mubr.msk.f32.mxu0 %vm6158_vm0, %v6157_v0  ;;  %5619 = vmatprep.mubr.msk.f32.mxu1 %vm6158_vm0, %v6157_v0 }
  0xde   :  { %5591 = vmatmul.mubr.msk.f32.gmra.mrb[10].mxu0 %vm101_vm2, %v6654_v56  ;;  %5620 = vmatmul.mubr.msk.f32.gmra.mrb[10].mxu1 %vm101_vm2, %v4979_v12 }
  0xdf   :  { %5593 = vmatprep.mubr.msk.f32.mxu0 %vm6158_vm0, %v6157_v0  ;;  %5622 = vmatprep.mubr.msk.f32.mxu1 %vm6158_vm0, %v6157_v0 }
  0xe2   :  { %5594 = vmatmul.mubr.msk.f32.gmra.mrb[12].mxu0 %vm101_vm2, %v6667_v57  ;;  %5623 = vmatmul.mubr.msk.f32.gmra.mrb[12].mxu1 %vm101_vm2, %v4980_v13 }
  0xe3   :  { %5596 = vmatprep.mubr.msk.f32.mxu0 %vm6158_vm0, %v6157_v0  ;;  %5625 = vmatprep.mubr.msk.f32.mxu1 %vm6158_vm0, %v6157_v0 }
  0xe6   :  { %5597 = vmatmul.mubr.msk.f32.gmra.mrb[14].mxu0 %vm101_vm2, %v6680_v58  ;;  %5626 = vmatmul.mubr.msk.f32.gmra.mrb[14].mxu1 %vm101_vm2, %v4981_v14 }
  0xe7   :  { %5599 = vmatprep.mubr.msk.f32.mxu0 %vm6158_vm0, %v6157_v0  ;;  %5628 = vmatprep.mubr.msk.f32.mxu1 %vm6158_vm0, %v6157_v0 }
  0xea   :  { %5600 = vmatmul.mubr.msk.f32.gmra.mrb[16].mxu0 %vm101_vm2, %v6693_v59  ;;  %5629 = vmatmul.mubr.msk.f32.gmra.mrb[16].mxu1 %vm101_vm2, %v4982_v15 }
 0x19d   :  { %v1606_v18 = vpop.f32.mrb[0].mxu0  ;;  %v1743_v19 = vpop.f32.mrb[0].mxu1 }
 0x19e   :  { %v1806_v21 = vmax.f32 %v1606_v18, %v1743_v19  ;;  %v5577_v22 = vpop.f32.mrb[1].mxu0  ;;  %v5606_v23 = vpop.f32.mrb[1].mxu1 }
 0x1a0   :  { %v1819_v24 = vadd.f32 %v6903_v20, %v1806_v21 }
 0x1a1   :  { %v1611_v25 = vpop.f32.mrb[2].mxu0  ;;  %v1748_v26 = vpop.f32.mrb[2].mxu1 }
 0x1a2   :  { %v1828_v27 = vmul.f32 0.5, %v1819_v24  ;;  %v1807_v28 = vmax.f32 %v1611_v25, %v1748_v26  ;;  %v5580_v29 = vpop.f32.mrb[3].mxu0  ;;  %v5609_v30 = vpop.f32.mrb[3].mxu1 }
 0x1a4   :  { %6086 = vtanh.f32 %v1828_v27  ;;  %v1820_v31 = vadd.f32 %v6903_v20, %v1807_v28 }
 0x1a5   :  { %v1616_v32 = vpop.f32.mrb[4].mxu0  ;;  %v1753_v33 = vpop.f32.mrb[4].mxu1 }
 0x1a6   :  { %v1829_v34 = vmul.f32 0.5, %v1820_v31  ;;  %v1808_v35 = vmax.f32 %v1616_v32, %v1753_v33  ;;  %v5583_v36 = vpop.f32.mrb[5].mxu0  ;;  %v5612_v37 = vpop.f32.mrb[5].mxu1 }
 0x1a8   :  { %6088 = vtanh.f32 %v1829_v34  ;;  %v1821_v38 = vadd.f32 %v6903_v20, %v1808_v35 }
 0x1a9   :  { %v1621_v39 = vpop.f32.mrb[6].mxu0  ;;  %v1758_v40 = vpop.f32.mrb[6].mxu1 }
 0x1aa   :  { %v1830_v41 = vmul.f32 0.5, %v1821_v38  ;;  %v1809_v42 = vmax.f32 %v1621_v39, %v1758_v40  ;;  %v5586_v43 = vpop.f32.mrb[7].mxu0  ;;  %v5615_v44 = vpop.f32.mrb[7].mxu1 }
 0x1ac   :  { %6090 = vtanh.f32 %v1830_v41  ;;  %v1822_v45 = vadd.f32 %v6903_v20, %v1809_v42 }
 0x1ad   :  { %v1626_v46 = vpop.f32.mrb[8].mxu0  ;;  %v1763_v47 = vpop.f32.mrb[8].mxu1 }
 0x1ae   :  { %v6087_v48 = vpop.eup %6086  ;;  %v1831_v49 = vmul.f32 0.5, %v1822_v45  ;;  %v1810_v50 = vmax.f32 %v1626_v46, %v1763_v47  ;;  %v5589_v51 = vpop.f32.mrb[9].mxu0 }
 0x1af   :  { %v5618_v52 = vpop.f32.mrb[9].mxu1  ;;  %v1846_v53 = vmul.f32 0.5, %v6087_v48 }
 0x1b0   :  { %6092 = vtanh.f32 %v1831_v49  ;;  %v1823_v54 = vadd.f32 %v6903_v20, %v1810_v50  ;;  %v2223_v52 = vld [vmem:[%s7153_s1 + $0x40] sm:$0xf] }
 0x1b1   :  { %v1855_v55 = vadd.f32 0.5, %v1846_v53  ;;  %v1631_v56 = vpop.f32.mrb[10].mxu0  ;;  %v1768_v57 = vpop.f32.mrb[10].mxu1 }
 0x1b2   :  { %v6089_v58 = vpop.eup %6088  ;;  %v1832_v59 = vmul.f32 0.5, %v1823_v54  ;;  %v1811_v60 = vmax.f32 %v1631_v56, %v1768_v57  ;;  %v5592_v61 = vpop.f32.mrb[11].mxu0  ;;  %v2391_v56 = vld [vmem:[%s7153_s1 + $0x48] sm:$0xf] }
 0x1b3   :  { %v5621_v62 = vpop.f32.mrb[11].mxu1  ;;  %1865 = vst.msk [vmem:[#allocation2] sm:$0xff] %vm1864_vm4, %v1855_v55  ;;  %v1847_v63 = vmul.f32 0.5, %v6089_v58  ;;  %v2559_v58 = vld [vmem:[%s7153_s1 + $0x50] sm:$0xf] }
 0x1b4   :  { %6094 = vtanh.f32 %v1832_v59  ;;  %v1824_v1 = vadd.f32 %v6903_v20, %v1811_v60  ;;  %v2727_v61 = vld [vmem:[%s7153_s1 + $0x58] sm:$0xf] }
 0x1b5   :  { %v1856_v2 = vadd.f32 0.5, %v1847_v63  ;;  %v1636_v3 = vpop.f32.mrb[12].mxu0  ;;  %v1773_v4 = vpop.f32.mrb[12].mxu1 }
 0x1b6   :  { %v6091_v5 = vpop.eup %6090  ;;  %v1833_v6 = vmul.f32 0.5, %v1824_v1  ;;  %v1812_v7 = vmax.f32 %v1636_v3, %v1773_v4  ;;  %v5595_v8 = vpop.f32.mrb[13].mxu0  ;;  %v2895_v1 = vld [vmem:[%s7153_s1 + $0x60] sm:$0xf]  ;;  %v3063_v4 = vld [vmem:[%s7153_s1 + $0x68] sm:$0xf] }
 0x1b7   :  { %v5624_v9 = vpop.f32.mrb[13].mxu1  ;;  %1866 = vst.msk [vmem:[#allocation2 + $0x8] sm:$0xff] %vm1864_vm4, %v1856_v2  ;;  %v1848_v10 = vmul.f32 0.5, %v6091_v5 }
 0x1b8   :  { %6096 = vtanh.f32 %v1833_v6  ;;  %v1825_v11 = vadd.f32 %v6903_v20, %v1812_v7  ;;  %v3255_v9 = vld [vmem:[%s7153_s1 + $0x78] sm:$0xff] }
 0x1b9   :  { %v1857_v12 = vadd.f32 0.5, %v1848_v10  ;;  %v1641_v13 = vpop.f32.mrb[14].mxu0  ;;  %v1778_v14 = vpop.f32.mrb[14].mxu1 }
 0x1ba   :  { %v6093_v15 = vpop.eup %6092  ;;  %v1834_v16 = vmul.f32 0.5, %v1825_v11  ;;  %v1813_v18 = vmax.f32 %v1641_v13, %v1778_v14  ;;  %v5598_v19 = vpop.f32.mrb[15].mxu0 }
 0x1bb   :  { %v5627_v21 = vpop.f32.mrb[15].mxu1  ;;  %1867 = vst.msk [vmem:[#allocation2 + $0x10] sm:$0xff] %vm1864_vm4, %v1857_v12  ;;  %v1849_v22 = vmul.f32 0.5, %v6093_v15  ;;  %v5052_v12 = vld [vmem:[%s7153_s1 + $0x99] ss:$0 sm:$0xff] }
 0x1bc   :  { %6098 = vtanh.f32 %v1834_v16  ;;  %v1826_v23 = vadd.f32 %v6903_v20, %v1813_v18 }
 0x1bd   :  { %v1858_v24 = vadd.f32 0.5, %v1849_v22  ;;  %v1646_v25 = vpop.f32.mrb[16].mxu0  ;;  %v1783_v26 = vpop.f32.mrb[16].mxu1 }
 0x1be   :  { %v6095_v27 = vpop.eup %6094  ;;  %v1835_v28 = vmul.f32 0.5, %v1826_v23  ;;  %v1814_v29 = vmax.f32 %v1646_v25, %v1783_v26  ;;  %v5601_v30 = vpop.f32.mrb[17].mxu0 }
 0x1bf   :  { %v5630_v31 = vpop.f32.mrb[17].mxu1  ;;  %1868 = vst.msk [vmem:[#allocation2 + $0x18] sm:$0xff] %vm1864_vm4, %v1858_v24  ;;  %v1850_v32 = vmul.f32 0.5, %v6095_v27 }
 0x1c0   :  { %6100 = vtanh.f32 %v1835_v28  ;;  %v1827_v33 = vadd.f32 %v6903_v20, %v1814_v29  ;;  %v3251_v29 = vld [vmem:[%s7153_s1 + $0x70] sm:$0xff] }
 0x1c1   :  { %v1859_v34 = vadd.f32 0.5, %v1850_v32  ;;  %v3552_v32 = vld [vmem:[%s7153_s1 + $0x80] sm:$0xff] }
 0x1c2   :  { %v6097_v35 = vpop.eup %6096  ;;  %v1836_v36 = vmul.f32 0.5, %v1827_v33 }
 0x1c3   :  { %1869 = vst.msk [vmem:[#allocation2 + $0x20] sm:$0xff] %vm1864_vm4, %v1859_v34  ;;  %v1851_v37 = vmul.f32 0.5, %v6097_v35  ;;  %v3700_v35 = vld [vmem:[%s7153_s1 + $0x88] sm:$0xff] }
 0x1c4   :  { %6102 = vtanh.f32 %v1836_v36 }
 0x1c5   :  { %v1860_v38 = vadd.f32 0.5, %v1851_v37  ;;  %v3848_v37 = vld [vmem:[%s7153_s1 + $0x90] sm:$0xff] }
 0x1c6   :  { %v6099_v39 = vpop.eup %6098  ;;  %v1885_v40 = vld [vmem:[#allocation2 + $0x1] ss:$4 sm:$0xff]  ;;  %v1889_v41 = vld [vmem:[#allocation2 + $0x3] ss:$4 sm:$0xff]  ;;  %v1876_v51 = vld [vmem:[#allocation2] ss:$4 sm:$0xff] }
 0x1c7   :  { %1870 = vst.msk [vmem:[#allocation2 + $0x28] sm:$0xff] %vm1864_vm4, %v1860_v38  ;;  %v1852_v42 = vmul.f32 0.5, %v6099_v39  ;;  %5633 = vmatprep.mubr.msk.f32.mxu0 %vm1864_vm4, %v1885_v40  ;;  %5638 = vmatprep.mubr.msk.f32.mxu1 %vm1864_vm4, %v1889_v41  ;;  %v1880_v53 = vld [vmem:[#allocation2 + $0x2] ss:$4 sm:$0xff] }
 0x1c8   :  { %v4008_v40 = vld [vmem:[%s7153_s1 + $0xa0] sm:$0xff] }
 0x1c9   :  { %v1861_v43 = vadd.f32 0.5, %v1852_v42 }
 0x1ca   :  { %v6101_v20 = vpop.eup %6100  ;;  %v2393_v59 = vld [vmem:[#allocation2 + $0x5] ss:$4 sm:$0xff]  ;;  %v2561_v62 = vld [vmem:[#allocation2 + $0x6] ss:$4 sm:$0xff]  ;;  %v2729_v2 = vld [vmem:[#allocation2 + $0x7] ss:$4 sm:$0xff] }
 0x1cb   :  { %1871 = vst.msk [vmem:[#allocation2 + $0x30] sm:$0xff] %vm1864_vm4, %v1861_v43  ;;  %v1853_v44 = vmul.f32 0.5, %v6101_v20  ;;  %v2897_v5 = vld [vmem:[#allocation2 + $0x8] ss:$4 sm:$0xff]  ;;  %v3065_v7 = vld [vmem:[#allocation2 + $0x9] ss:$4 sm:$0xff] }
 0x1cc   :  { %v6159_v43 = vmov 0.0|0.0  }
 0x1cd   :  { %v1862_v45 = vadd.f32 0.5, %v1853_v44 }
 0x1ce   :  { %v6103_v46 = vpop.eup %6102 }
 0x1cf   :  { %1872 = vst.msk [vmem:[#allocation2 + $0x38] sm:$0xff] %vm1864_vm4, %v1862_v45  ;;  %v1854_v47 = vmul.f32 0.5, %v6103_v46  ;;  %v5063_v45 = vld [vmem:[%s7153_s1 + $0x9a] ss:$0 sm:$0xff] }
 0x1d1   :  { %v1863_v48 = vadd.f32 0.5, %v1854_v47 }
 0x1d3   :  { %1874 = vst.msk [vmem:[#allocation2 + $0x40] sm:$0x3f] %vm1873_vm5, %v1863_v48 }
 0x1d6   :  { %v1887_v49 = vld [vmem:[#allocation2 + $0x21] ss:$4 sm:$0xff]  ;;  %v1891_v50 = vld [vmem:[#allocation2 + $0x23] ss:$4 sm:$0xff]  ;;  %v1878_v54 = vld [vmem:[#allocation2 + $0x20] ss:$4 sm:$0xff] }
 0x1d7   :  { %5634 = vmatmul.mubr.msk.f32.vlgmr.msra.gmra.mrb[18].mxu0 %vm1864_vm4, %v1887_v49  ;;  %5639 = vmatmul.mubr.msk.f32.vlgmr.msra.gmra.mrb[18].mxu1 %vm1864_vm4, %v1891_v50  ;;  %v1882_v55 = vld [vmem:[#allocation2 + $0x22] ss:$4 sm:$0xff] }
 0x1d8   :  { %5642 = vmatpush3.msk.msra.mxu0 %vm1898_vm3, %v6894_v17  ;;  %5643 = vmatprep.mubr.msk.f32.mxu0 %vm1864_vm4, %v1876_v51  ;;  %v4085_v51 = vld [vmem:[%s7153_s1 + $0xb0] sm:$0xff] }
 0x1d9   :  { %5647 = vmatpush3.msk.msra.mxu1 %vm1898_vm3, %v6894_v17  ;;  %5648 = vmatprep.mubr.msk.f32.mxu1 %vm1864_vm4, %v1880_v53  ;;  %v2225_v17 = vld [vmem:[#allocation2 + $0x4] ss:$4 sm:$0xff] }
 0x1da   :  { %5651 = vmatprep.subr.msk.mxu0 %vm1898_vm3, %v2223_v52  ;;  %5656 = vmatprep.subr.msk.mxu1 %vm1898_vm3, %v2223_v52  ;;  %v2227_v57 = vld [vmem:[#allocation2 + $0x24] ss:$4 sm:$0xff]  ;;  %v2395_v60 = vld [vmem:[#allocation2 + $0x25] ss:$4 sm:$0xff]  ;;  %v2563_v63 = vld [vmem:[#allocation2 + $0x26] ss:$4 sm:$0xff] }
 0x1db   :  { %v2731_v3 = vld [vmem:[#allocation2 + $0x27] ss:$4 sm:$0xff]  ;;  %v2899_v6 = vld [vmem:[#allocation2 + $0x28] ss:$4 sm:$0xff]  ;;  %v3067_v8 = vld [vmem:[#allocation2 + $0x29] ss:$4 sm:$0xff] }
 0x1df   :  { %5644 = vmatmul.mubr.msk.f32.vlgmr.msra.gmra.mrb[18].mxu0 %vm1864_vm4, %v1878_v54  ;;  %5649 = vmatmul.mubr.msk.f32.vlgmr.msra.gmra.mrb[18].mxu1 %vm1864_vm4, %v1882_v55 }
 0x1e0   :  { %5652 = vmatpush3.msk.msra.mxu0 %vm1898_vm3, %v2223_v52  ;;  %5653 = vmatprep.mubr.msk.f32.mxu0 %vm1864_vm4, %v1880_v53 }
 0x1e1   :  { %5657 = vmatpush3.msk.msra.mxu1 %vm1898_vm3, %v2223_v52  ;;  %5658 = vmatprep.mubr.msk.f32.mxu1 %vm1864_vm4, %v2225_v17  ;;  %v4086_v52 = vld [vmem:[%s7153_s1 + $0xb8] sm:$0xff] }
 0x1e2   :  { %5661 = vmatprep.subr.msk.mxu0 %vm1898_vm3, %v2391_v56  ;;  %5666 = vmatprep.subr.msk.mxu1 %vm1898_vm3, %v2391_v56 }
 0x1e7   :  { %5654 = vmatmul.mubr.msk.f32.vlgmr.msra.gmra.mrb[18].mxu0 %vm1864_vm4, %v1882_v55  ;;  %5659 = vmatmul.mubr.msk.f32.vlgmr.msra.gmra.mrb[18].mxu1 %vm1864_vm4, %v2227_v57  ;;  %v5797_v55 = vpack.c.bf16 %v4086_v52, %v4085_v51  ;;  %v4334_v51 = vld [vmem:[#allocation4 + $0x30] sm:$0xff] }
 0x1e8   :  { %5662 = vmatpush3.msk.msra.mxu0 %vm1898_vm3, %v2391_v56  ;;  %5663 = vmatprep.mubr.msk.f32.mxu0 %vm1864_vm4, %v1889_v41  ;;  %v4009_v41 = vld [vmem:[%s7153_s1 + $0xa8] sm:$0xff] }
 0x1e9   :  { %5667 = vmatpush3.msk.msra.mxu1 %vm1898_vm3, %v2391_v56  ;;  %5668 = vmatprep.mubr.msk.f32.mxu1 %vm1864_vm4, %v2393_v59  ;;  %v5794_v42 = vpack.c.bf16 %v4009_v41, %v4008_v40  ;;  %v4341_v40 = vld [vmem:[#allocation4 + $0x68] sm:$0xff]  ;;  %v4335_v41 = vld [vmem:[#allocation4 + $0x38] sm:$0xff]  ;;  %v4342_v52 = vld [vmem:[#allocation4 + $0x70] sm:$0xff] }
 0x1ea   :  { %5671 = vmatprep.subr.msk.mxu0 %vm1898_vm3, %v2559_v58  ;;  %5676 = vmatprep.subr.msk.mxu1 %vm1898_vm3, %v2559_v58 }
 0x1ef   :  { %5664 = vmatmul.mubr.msk.f32.vlgmr.msra.gmra.mrb[18].mxu0 %vm1864_vm4, %v1891_v50  ;;  %5669 = vmatmul.mubr.msk.f32.vlgmr.msra.gmra.mrb[18].mxu1 %vm1864_vm4, %v2395_v60 }
 0x1f0   :  { %5672 = vmatpush3.msk.msra.mxu0 %vm1898_vm3, %v2559_v58  ;;  %5673 = vmatprep.mubr.msk.f32.mxu0 %vm1864_vm4, %v2225_v17  ;;  %v4161_v17 = vld [vmem:[%s7153_s1 + $0xc0] sm:$0xff] }
 0x1f1   :  { %5677 = vmatpush3.msk.msra.mxu1 %vm1898_vm3, %v2559_v58  ;;  %5678 = vmatprep.mubr.msk.f32.mxu1 %vm1864_vm4, %v2561_v62 }
 0x1f2   :  { %5681 = vmatprep.subr.msk.mxu0 %vm1898_vm3, %v2727_v61  ;;  %5686 = vmatprep.subr.msk.mxu1 %vm1898_vm3, %v2727_v61 }
 0x1f7   :  { %5674 = vmatmul.mubr.msk.f32.vlgmr.msra.gmra.mrb[18].mxu0 %vm1864_vm4, %v2227_v57  ;;  %5679 = vmatmul.mubr.msk.f32.vlgmr.msra.gmra.mrb[18].mxu1 %vm1864_vm4, %v2563_v63  ;;  %v4162_v57 = vld [vmem:[%s7153_s1 + $0xc8] sm:$0xff] }
 0x1f8   :  { %5682 = vmatpush3.msk.msra.mxu0 %vm1898_vm3, %v2727_v61  ;;  %5683 = vmatprep.mubr.msk.f32.mxu0 %vm1864_vm4, %v2393_v59  ;;  %v5800_v58 = vpack.c.bf16 %v4162_v57, %v4161_v17  ;;  %v4359_v17 = vld [vmem:[#allocation4 + $0xf8] sm:$0x3f] }
 0x1f9   :  { %5687 = vmatpush3.msk.msra.mxu1 %vm1898_vm3, %v2727_v61  ;;  %5688 = vmatprep.mubr.msk.f32.mxu1 %vm1864_vm4, %v2729_v2  ;;  %v4241_v61 = vld [vmem:[%s7153_s1 + $0xd8] sm:$0xff] }
 0x1fa   :  { %5691 = vmatprep.subr.msk.mxu0 %vm1898_vm3, %v2895_v1  ;;  %5696 = vmatprep.subr.msk.mxu1 %vm1898_vm3, %v2895_v1 }
 0x1ff   :  { %5684 = vmatmul.mubr.msk.f32.vlgmr.msra.gmra.mrb[18].mxu0 %vm1864_vm4, %v2395_v60  ;;  %5689 = vmatmul.mubr.msk.f32.vlgmr.msra.gmra.mrb[18].mxu1 %vm1864_vm4, %v2731_v3 }
 0x200   :  { %5692 = vmatpush3.msk.msra.mxu0 %vm1898_vm3, %v2895_v1  ;;  %5693 = vmatprep.mubr.msk.f32.mxu0 %vm1864_vm4, %v2561_v62  ;;  %v4242_v62 = vld [vmem:[%s7153_s1 + $0xe0] sm:$0xff] }
 0x201   :  { %5697 = vmatpush3.msk.msra.mxu1 %vm1898_vm3, %v2895_v1  ;;  %5698 = vmatprep.mubr.msk.f32.mxu1 %vm1864_vm4, %v2897_v5  ;;  %v4243_v1 = vld [vmem:[%s7153_s1 + $0xe8] sm:$0xff]  ;;  %v4007_v5 = vld [vmem:[%s7153_s1 + $0xd0] sm:$0x1] }
 0x202   :  { %5701 = vmatprep.subr.msk.mxu0 %vm1898_vm3, %v3063_v4  ;;  %5706 = vmatprep.subr.msk.mxu1 %vm1898_vm3, %v3063_v4 }
 0x207   :  { %5694 = vmatmul.mubr.msk.f32.vlgmr.msra.gmra.mrb[18].mxu0 %vm1864_vm4, %v2563_v63  ;;  %5699 = vmatmul.mubr.msk.f32.vlgmr.msra.gmra.mrb[18].mxu1 %vm1864_vm4, %v2899_v6  ;;  %v5803_v63 = vpack.c.bf16 %v4242_v62, %v4241_v61 }
 0x208   :  { %5702 = vmatpush3.msk.msra.mxu0 %vm1898_vm3, %v3063_v4  ;;  %5703 = vmatprep.mubr.msk.f32.mxu0 %vm1864_vm4, %v2729_v2  ;;  %v4244_v2 = vld [vmem:[%s7153_s1 + $0xf0] sm:$0x3f] }
 0x209   :  { %5707 = vmatpush3.msk.msra.mxu1 %vm1898_vm3, %v3063_v4  ;;  %5708 = vmatprep.mubr.msk.f32.mxu1 %vm1864_vm4, %v3065_v7 }
 0x20a   :  { %5711 = vmatprep.subr.mxu0 %v6157_v0  ;;  %5716 = vmatprep.subr.mxu1 %v6157_v0 }
 0x20f   :  { %5704 = vmatmul.mubr.msk.f32.vlgmr.msra.gmra.mrb[18].mxu0 %vm1864_vm4, %v2731_v3  ;;  %5709 = vmatmul.mubr.msk.f32.vlgmr.msra.gmra.mrb[18].mxu1 %vm1864_vm4, %v3067_v8  ;;  %v5806_v3 = vpack.c.bf16 %v4244_v2, %v4243_v1  ;;  %v4356_v1 = vld [vmem:[#allocation4 + $0xe0] sm:$0x3f]  ;;  %v4350_v2 = vld [vmem:[#allocation4 + $0xb0] sm:$0xff] }
 0x210   :  { %5713 = vmatprep.mubr.msk.f32.mxu0 %vm6158_vm0, %v6157_v0  ;;  %5718 = vmatprep.mubr.msk.f32.mxu1 %vm6158_vm0, %v6157_v0 }
 0x211   :  { %5712 = vmatpush3.msra.mxu0 %v3255_v9  ;;  %5717 = vmatpush3.msra.mxu1 %v3255_v9 }
 0x212   :  { %5721 = vmatprep.subr.mxu0 %v6157_v0  ;;  %5726 = vmatprep.subr.mxu1 %v6157_v0 }
 0x2e2   :  { %v5705_v10 = vpop.f32.mrb[18].mxu0  ;;  %v5710_v11 = vpop.f32.mrb[18].mxu1 }
 0x2e3   :  { %v3233_v13 = vmax.f32 %v5705_v10, %v5710_v11  ;;  %v3137_v14 = vpop.f32.mrb[19].mxu0  ;;  %v3218_v15 = vpop.f32.mrb[19].mxu1 }
 0x2e4   :  { %v3232_v16 = vmax.f32 %v3137_v14, %v3218_v15  ;;  %v4337_v14 = vld [vmem:[#allocation4 + $0x48] sm:$0xff]  ;;  %v4331_v15 = vld [vmem:[#allocation4 + $0x18] sm:$0xff] }
 0x2e5   :  { %v3239_v18 = vadd.f32 %v5052_v12, %v3233_v13  ;;  %v4329_v13 = vld [vmem:[#allocation4 + $0x8] sm:$0xff] }
 0x2e6   :  { %v3238_v19 = vadd.f32 %v5052_v12, %v3232_v16  ;;  %v5809_v16 = vpack.c.bf16 %v4337_v14, %v4329_v13 }
 0x2e7   :  { %v3241_v21 = vmul.f32 0.5, %v3239_v18  ;;  %v4339_v18 = vld [vmem:[#allocation4 + $0x58] sm:$0xff] }
 0x2e8   :  { %v3240_v22 = vmul.f32 0.5, %v3238_v19  ;;  %v4328_v19 = vld [vmem:[#allocation4] sm:$0xff] }
 0x2e9   :  { %6104 = vtanh.f32 %v3241_v21  ;;  %v4336_v21 = vld [vmem:[#allocation4 + $0x40] sm:$0xff] }
 0x2ea   :  { %6106 = vtanh.f32 %v3240_v22  ;;  %v5819_v22 = vpack.c.bf16 %v4339_v18, %v4331_v15 }
 0x2f3   :  { %v6105_v23 = vpop.eup %6104 }
 0x2f4   :  { %v6107_v24 = vpop.eup %6106  ;;  %v3245_v25 = vmul.f32 0.5, %v6105_v23  ;;  %v5811_v23 = vpack.c.bf16 %v4336_v21, %v4328_v19 }
 0x2f5   :  { %v3244_v26 = vmul.f32 0.5, %v6107_v24  ;;  %v4330_v24 = vld [vmem:[#allocation4 + $0x10] sm:$0xff] }
 0x2f6   :  { %v3247_v27 = vadd.f32 0.5, %v3245_v25  ;;  %v4338_v25 = vld [vmem:[#allocation4 + $0x50] sm:$0xff] }
 0x2f7   :  { %v3246_v28 = vadd.f32 0.5, %v3244_v26  ;;  %v5821_v26 = vpack.c.bf16 %v4338_v25, %v4330_v24 }
 0x2f8   :  { %3250 = vst.msk [vmem:[#allocation3 + $0x8] sm:$0xff] %vm3248_vm6, %v3247_v27  ;;  %v4345_v27 = vld [vmem:[#allocation4 + $0x88] sm:$0xff] }
 0x2f9   :  { %3249 = vst.msk [vmem:[#allocation3] sm:$0xff] %vm3248_vm6, %v3246_v28  ;;  %v4353_v28 = vld [vmem:[#allocation4 + $0xc8] sm:$0x3f] }
 0x300   :  { %v3257_v30 = vld [vmem:[#allocation3 + $0x1] ss:$4 sm:$0x7]  ;;  %v3259_v31 = vld [vmem:[#allocation3 + $0x3] ss:$4 sm:$0x7] }
 0x301   :  { %5714 = vmatmul.mubr.msk.f32.vlgmr.msra.gmra.mrb[20].mxu0 %vm3248_vm6, %v3257_v30  ;;  %5719 = vmatmul.mubr.msk.f32.vlgmr.msra.gmra.mrb[20].mxu1 %vm3248_vm6, %v3259_v31  ;;  %v3252_v33 = vld [vmem:[#allocation3] ss:$4 sm:$0x7]  ;;  %v3254_v34 = vld [vmem:[#allocation3 + $0x2] ss:$4 sm:$0x7]  ;;  %v5813_v30 = vpack.c.bf16 %v4353_v28, %v4345_v27 }
 0x302   :  { %5722 = vmatpush3.msra.mxu0 %v3251_v29  ;;  %5727 = vmatpush3.msra.mxu1 %v3251_v29  ;;  %v3554_v36 = vld [vmem:[#allocation3 + $0x4] ss:$4 sm:$0x7]  ;;  %v3702_v38 = vld [vmem:[#allocation3 + $0x5] ss:$4 sm:$0x7] }
 0x303   :  { %5723 = vmatprep.mubr.msk.f32.mxu0 %vm6158_vm0, %v6157_v0  ;;  %5728 = vmatprep.mubr.msk.f32.mxu1 %vm6158_vm0, %v6157_v0  ;;  %v3850_v39 = vld [vmem:[#allocation3 + $0x6] ss:$4 sm:$0x7] }
 0x304   :  { %5731 = vmatprep.subr.mxu0 %v6157_v0  ;;  %5736 = vmatprep.subr.mxu1 %v6157_v0  ;;  %v4347_v29 = vld [vmem:[#allocation4 + $0x98] sm:$0xff] }
 0x309   :  { %5724 = vmatmul.mubr.msk.f32.vlgmr.msra.gmra.mrb[20].mxu0 %vm3248_vm6, %v3252_v33  ;;  %5729 = vmatmul.mubr.msk.f32.vlgmr.msra.gmra.mrb[20].mxu1 %vm3248_vm6, %v3254_v34  ;;  %v4352_v33 = vld [vmem:[#allocation4 + $0xc0] sm:$0x3f] }
 0x30a   :  { %5732 = vmatpush3.msra.mxu0 %v3552_v32  ;;  %5737 = vmatpush3.msra.mxu1 %v3552_v32  ;;  %v4344_v32 = vld [vmem:[#allocation4 + $0x80] sm:$0xff] }
 0x30b   :  { %5733 = vmatprep.mubr.msk.f32.mxu0 %vm6158_vm0, %v6157_v0  ;;  %5738 = vmatprep.mubr.msk.f32.mxu1 %vm6158_vm0, %v6157_v0 }
 0x30c   :  { %5741 = vmatprep.subr.mxu0 %v6157_v0  ;;  %5746 = vmatprep.subr.mxu1 %v6157_v0 }
 0x311   :  { %5734 = vmatmul.mubr.msk.f32.vlgmr.msra.gmra.mrb[20].mxu0 %vm3248_vm6, %v3254_v34  ;;  %5739 = vmatmul.mubr.msk.f32.vlgmr.msra.gmra.mrb[20].mxu1 %vm3248_vm6, %v3554_v36 }
 0x312   :  { %5742 = vmatpush3.msra.mxu0 %v3700_v35  ;;  %5747 = vmatpush3.msra.mxu1 %v3700_v35  ;;  %v5816_v35 = vpack.c.bf16 %v4352_v33, %v4344_v32 }
 0x313   :  { %5743 = vmatprep.mubr.msk.f32.mxu0 %vm6158_vm0, %v6157_v0  ;;  %5748 = vmatprep.mubr.msk.f32.mxu1 %vm6158_vm0, %v6157_v0 }
 0x314   :  { %5751 = vmatprep.subr.mxu0 %v6157_v0  ;;  %5756 = vmatprep.subr.mxu1 %v6157_v0 }
 0x319   :  { %5744 = vmatmul.mubr.msk.f32.vlgmr.msra.gmra.mrb[20].mxu0 %vm3248_vm6, %v3259_v31  ;;  %5749 = vmatmul.mubr.msk.f32.vlgmr.msra.gmra.mrb[20].mxu1 %vm3248_vm6, %v3702_v38  ;;  %v4355_v31 = vld [vmem:[#allocation4 + $0xd8] sm:$0x3f] }
 0x31a   :  { %5752 = vmatpush3.msra.mxu0 %v3848_v37  ;;  %5757 = vmatpush3.msra.mxu1 %v3848_v37  ;;  %v5823_v34 = vpack.c.bf16 %v4355_v31, %v4347_v29  ;;  %v4354_v37 = vld [vmem:[#allocation4 + $0xd0] sm:$0x3f] }
 0x31b   :  { %5753 = vmatprep.mubr.msk.f32.mxu0 %vm6158_vm0, %v6157_v0  ;;  %5758 = vmatprep.mubr.msk.f32.mxu1 %vm6158_vm0, %v6157_v0 }
 0x31c   :  { %5793 = vmatprep.subr.bf16.mxu0 %v6159_v43  ;;  %5802 = vmatprep.subr.bf16.mxu1 %v6159_v43 }
 0x321   :  { %5754 = vmatmul.mubr.msk.f32.vlgmr.msra.gmra.mrb[20].mxu0 %vm3248_vm6, %v3554_v36  ;;  %5759 = vmatmul.mubr.msk.f32.vlgmr.msra.gmra.mrb[20].mxu1 %vm3248_vm6, %v3850_v39  ;;  %v4346_v36 = vld [vmem:[#allocation4 + $0x90] sm:$0xff]  ;;  %v4333_v39 = vld [vmem:[#allocation4 + $0x28] sm:$0xff] }
 0x322   :  { %5765 = vmatprep.mubr.msk.f32.mxu0 %vm6158_vm0, %v6157_v0  ;;  %5790 = vmatprep.mubr.msk.f32.mxu1 %vm6158_vm0, %v6157_v0  ;;  %v5826_v38 = vpack.c.bf16 %v4354_v37, %v4346_v36 }
 0x323   :  { %5795 = vmatpush3.bf16.msra.mxu0 %v5794_v42  ;;  %5804 = vmatpush3.bf16.msra.mxu1 %v5803_v63  ;;  %v5829_v42 = vpack.c.bf16 %v4341_v40, %v4333_v39 }
 0x324   :  { %5796 = vmatprep.subr.bf16.mxu0 %v6159_v43  ;;  %5805 = vmatprep.subr.bf16.mxu1 %v6159_v43 }
 0x327   :  { %5808 = vmatpush3.bf16.msk.msra.mxu1 %vm7102_vm10, %v5806_v3  ;;  %v4358_v3 = vld [vmem:[#allocation4 + $0xf0] sm:$0x3f] }
 0x328   :  { %5810 = vmatprep.subr.bf16.mxu1 %v5809_v16 }
 0x3f4   :  { %v3917_v20 = vpop.f32.mrb[20].mxu0  ;;  %v3990_v44 = vpop.f32.mrb[20].mxu1 }
 0x3f5   :  { %v3997_v46 = vmax.f32 %v3917_v20, %v3990_v44  ;;  %v5755_v47 = vpop.f32.mrb[21].mxu0  ;;  %v5760_v48 = vpop.f32.mrb[21].mxu1  ;;  %v4245_v44 = vld [vmem:[%s7153_s1 + $0xf8] sm:$0x1] }
 0x3f7   :  { %v4002_v49 = vadd.f32 %v5063_v45, %v3997_v46 }
 0x3f9   :  { %v4003_v50 = vmul.f32 0.5, %v4002_v49  ;;  %v4332_v49 = vld [vmem:[#allocation4 + $0x20] sm:$0xff] }
 0x3fb   :  { %6108 = vtanh.f32 %v4003_v50  ;;  %v4340_v50 = vld [vmem:[#allocation4 + $0x60] sm:$0xff] }
 0x405   :  { %v6109_v53 = vpop.eup %6108 }
 0x406   :  { %v4005_v54 = vmul.f32 0.5, %v6109_v53  ;;  %v4349_v53 = vld [vmem:[#allocation4 + $0xa8] sm:$0xff] }
 0x408   :  { %v4006_v56 = vadd.f32 0.5, %v4005_v54 }
 0x40a   :  { %5766 = vmatmul.mubr.msk.f32.vlgmr.msra.gmra.mrb[22].mxu0 %vm4010_vm7, %v4006_v56  ;;  %v4087_v59 = vrot.slane %v4006_v56, 1  ;;  %v4163_v60 = vrot.slane %v4006_v56, 2  ;;  %v4351_v56 = vld [vmem:[#allocation4 + $0xb8] sm:$0xff] }
 0x40b   :  { %5798 = vmatpush3.bf16.msra.mxu0 %v5797_v55  ;;  %5772 = vmatprep.mubr.msk.f32.mxu0 %vm6158_vm0, %v6157_v0  ;;  %v4357_v55 = vld [vmem:[#allocation4 + $0xe8] sm:$0x3f]  ;;  %v5843_v63 = vpack.c.bf16 %v4359_v17, %v4351_v56 }
 0x40c   :  { %5799 = vmatprep.subr.bf16.mxu0 %v6159_v43  ;;  %v4343_v43 = vld [vmem:[#allocation4 + $0x78] sm:$0xff]  ;;  %v5833_v62 = vpack.c.bf16 %v4357_v55, %v4349_v53 }
 0x40d   :  { %v5839_v20 = vpack.c.bf16 %v4343_v43, %v4335_v41 }
 0x412   :  { %5773 = vmatmul.mubr.msk.f32.vlgmr.msra.gmra.mrb[22].mxu0 %vm4010_vm7, %v4087_v59  ;;  %v5841_v59 = vpack.c.bf16 %v4342_v52, %v4334_v51 }
 0x413   :  { %5801 = vmatpush3.bf16.msra.mxu0 %v5800_v58  ;;  %5779 = vmatprep.mubr.msk.f32.mxu0 %vm6158_vm0, %v6157_v0  ;;  %v5831_v58 = vpack.c.bf16 %v4340_v50, %v4332_v49  ;;  %v6161_v49 = vmov 1966171168  }
 0x414   :  { %5820 = vmatprep.subr.bf16.mxu0 %v5819_v22  ;;  %v4761_v50 = vunpack.c.l.s4 %v6161_v49 }
 0x416   :  { %v4762_v56 = vunpack.c.0.s8 %v4761_v50 }
 0x41a   :  { %5780 = vmatmul.mubr.msk.f32.vlgmr.msra.gmra.mrb[22].mxu0 %vm4010_vm7, %v4163_v60  ;;  %v4348_v60 = vld [vmem:[#allocation4 + $0xa0] sm:$0xff] }
 0x41b   :  { %4567 = vmatprep.mubr.f32.mxu0 %v6157_v0  ;;  %5822 = vmatpush1.bf16.msra.mxu0 %v5821_v26 }
 0x41c   :  { %5825 = vmatprep.subr.msk.bf16.mxu0 %vm7102_vm10, %v5823_v34 }
 0x41f   :  { %5828 = vmatpush1.bf16.msk.msra.mxu0 %vm7102_vm10, %v5826_v38 }
 0x420   :  { %5840 = vmatprep.subr.bf16.mxu0 %v5839_v20 }
 0x4ed   :  { %v4232_v6 = vpop.f32.mrb[22].mxu0 }
 0x4ee   :  { %v5849_v7 = vadd.f32 %v4232_v6, %v4007_v5  ;;  %v5781_v8 = vpop.f32.mrb[23].mxu0  ;;  %v5836_v5 = vpack.c.bf16 %v4356_v1, %v4348_v60  ;;  %v5846_v6 = vpack.c.bf16 %v4358_v3, %v4350_v2 }
 0x4f0   :  { %v4237_v9 = vmul.f32 0.5, %v5849_v7  ;;  %v4365_v7 = vlaneseq }
 0x4f2   :  { %6110 = vtanh.f32 %v4237_v9  ;;  %v7138_v8 = vshrl.u32 %v4365_v7, 7  ;;  %v4361_v9 = vld [vmem:[#allocation4 + $0xc6] ss:$8 sm:$0xf] }
 0x4f4   :  { %v4371_v13 = vsub.s32 1, %v7138_v8  ;;  %v4379_v14 = vsub.s32 3, %v7138_v8  ;;  %v4383_v26 = vsub.s32 4, %v7138_v8  ;;  %v4391_v27 = vsub.s32 6, %v7138_v8 }
 0x4f5   :  { %v4395_v31 = vsub.s32 7, %v7138_v8  ;;  %v4765_v1 = vsub.s32 %v4762_v56, %v7138_v8 }
 0x4fc   :  { %v6111_v10 = vpop.eup %6110 }
 0x4fd   :  { %v4239_v11 = vmul.f32 0.5, %v6111_v10  ;;  %v4362_v10 = vld [vmem:[#allocation4 + $0xc6] ss:$8 sm:$0xf0] }
 0x4ff   :  { %v4240_v12 = vadd.f32 0.5, %v4239_v11  ;;  %v4363_v11 = vor.u32 %v4362_v10, %v4361_v9 }
 0x501   :  { %5791 = vmatmul.mubr.msk.f32.vlgmr.msra.gmra.mrb[22].mxu1 %vm4246_vm11, %v4240_v12  ;;  %v4367_v12 = vsub.s32 0, %v7138_v8  ;;  %v4372_v16 = vrot.slane %v4363_v11, %v4371_v13  ;;  %v4380_v18 = vrot.slane %v4363_v11, %v4379_v14  ;;  %v4384_v36 = vrot.slane %v4363_v11, %v4383_v26 }
 0x502   :  { %4496 = vmatprep.mubr.f32.mxu1 %v6157_v0  ;;  %5812 = vmatpush1.bf16.msra.mxu1 %v5811_v23  ;;  %v4392_v37 = vrot.slane %v4363_v11, %v4391_v27  ;;  %v4396_v39 = vrot.slane %v4363_v11, %v4395_v31 }
 0x503   :  { %5815 = vmatprep.subr.msk.bf16.mxu1 %vm7102_vm10, %v5813_v30  ;;  %v4368_v4 = vrot.slane %v4363_v11, %v4367_v12  ;;  %v4387_v30 = vsub.s32 5, %v7138_v8 }
 0x505   :  { %v4388_v38 = vrot.slane %v4363_v11, %v4387_v30 }
 0x506   :  { %5818 = vmatpush1.bf16.msk.msra.mxu1 %vm7102_vm10, %v5816_v35 }
 0x507   :  { %5830 = vmatprep.subr.bf16.mxu1 %v5829_v42 }
 0x5d4   :  { %v4320_v45 = vpop.f32.mrb[22].mxu1 }
 0x5d5   :  { %v4321_v46 = vadd.f32 %v4320_v45, %v4245_v44  ;;  %v5792_v47 = vpop.f32.mrb[23].mxu1 }
 0x5d7   :  { %v4324_v48 = vmul.f32 0.5, %v4321_v46 }
 0x5d9   :  { %6112 = vtanh.f32 %v4324_v48 }
 0x5e3   :  { %v6113_v54 = vpop.eup %6112 }
 0x5e4   :  { %v4326_v57 = vmul.f32 0.5, %v6113_v54 }
 0x5e6   :  { %v4327_v61 = vadd.f32 0.5, %v4326_v57 }
 0x5e8   :  { %5071 = vmatmul.mubr.msk.f32.vlgmr.msra.gmra.mrb[24].mxu1 %vm4246_vm11, %v4327_v61  ;;  %5074 = vmatmul.mubr.msk.f32.vlgmr.msra.gmra.mrb[24].mxu0 %vm4246_vm11, %v4327_v61 }
 0x5e9   :  { %5832 = vmatpush1.bf16.msra.mxu1 %v5831_v58  ;;  %5842 = vmatpush1.bf16.msra.mxu0 %v5841_v59 }
 0x5ea   :  { %5835 = vmatprep.subr.msk.bf16.mxu1 %vm7102_vm10, %v5833_v62  ;;  %5845 = vmatprep.subr.msk.bf16.mxu0 %vm7102_vm10, %v5843_v63 }
 0x5eb   :  { %4638 = vmatprep.mubr.f32.mxu1 %v6157_v0  ;;  %4709 = vmatprep.mubr.f32.mxu0 %v6157_v0  ;;  %v4375_v0 = vsub.s32 2, %v7138_v8 }
 0x5ed   :  { %5838 = vmatpush1.bf16.msk.msra.mxu1 %vm7102_vm10, %v5836_v5  ;;  %5848 = vmatpush1.bf16.msk.msra.mxu0 %vm7102_vm10, %v5846_v6  ;;  %v4376_v15 = vrot.slane %v4363_v11, %v4375_v0 }
 0x5f0   :  { %5077 = vmatmul.mubr.msk.f32.vlgmr.msra.gmra.mrb[26].mxu1 %vm4246_vm11, %v4327_v61  ;;  %5080 = vmatmul.mubr.msk.f32.vlgmr.msra.gmra.mrb[26].mxu0 %vm4246_vm11, %v4327_v61 }
 0x6bb   :  { %v4498_v19 = vpop.f32.mrb[24].mxu1  ;;  %v4569_v21 = vpop.f32.mrb[24].mxu0 }
 0x6bc   :  { %v4499_v22 = vadd.f32 %v4498_v19, %v4368_v4  ;;  %v4570_v23 = vadd.f32 %v4569_v21, %v4376_v15  ;;  %v4500_v24 = vpop.f32.mrb[25].mxu1  ;;  %v4571_v25 = vpop.f32.mrb[25].mxu0 }
 0x6bd   :  { %v4501_v28 = vadd.f32 %v4500_v24, %v4372_v16  ;;  %v4572_v29 = vadd.f32 %v4571_v25, %v4380_v18 }
 0x6be   :  { %v4716_v32 = vmul.f32 0.5, %v4499_v22  ;;  %v4718_v33 = vmul.f32 0.5, %v4570_v23 }
 0x6bf   :  { %v4717_v34 = vmul.f32 0.5, %v4501_v28  ;;  %v4719_v35 = vmul.f32 0.5, %v4572_v29 }
 0x6c0   :  { %6114 = vtanh.f32 %v4716_v32 }
 0x6c1   :  { %6116 = vtanh.f32 %v4718_v33 }
 0x6c2   :  { %6118 = vtanh.f32 %v4717_v34 }
 0x6c3   :  { %6120 = vtanh.f32 %v4719_v35  ;;  %v4640_v40 = vpop.f32.mrb[26].mxu1  ;;  %v4711_v41 = vpop.f32.mrb[26].mxu0 }
 0x6c4   :  { %v4641_v42 = vadd.f32 %v4640_v40, %v4384_v36  ;;  %v4712_v43 = vadd.f32 %v4711_v41, %v4392_v37  ;;  %v4642_v20 = vpop.f32.mrb[27].mxu1  ;;  %v4713_v44 = vpop.f32.mrb[27].mxu0 }
 0x6c5   :  { %v4643_v45 = vadd.f32 %v4642_v20, %v4388_v38  ;;  %v4714_v46 = vadd.f32 %v4713_v44, %v4396_v39 }
 0x6c6   :  { %v4720_v47 = vmul.f32 0.5, %v4641_v42  ;;  %v4722_v48 = vmul.f32 0.5, %v4712_v43 }
 0x6c7   :  { %v4721_v51 = vmul.f32 0.5, %v4643_v45  ;;  %v4723_v52 = vmul.f32 0.5, %v4714_v46 }
 0x6c8   :  { %6122 = vtanh.f32 %v4720_v47 }
 0x6c9   :  { %6124 = vtanh.f32 %v4722_v48 }
 0x6ca   :  { %v6115_v53 = vpop.eup %6114  ;;  %6126 = vtanh.f32 %v4721_v51 }
 0x6cb   :  { %v6117_v54 = vpop.eup %6116  ;;  %v4732_v55 = vmul.f32 0.5, %v6115_v53  ;;  %6128 = vtanh.f32 %v4723_v52 }
 0x6cc   :  { %v6119_v17 = vpop.eup %6118  ;;  %v4734_v57 = vmul.f32 0.5, %v6117_v54 }
 0x6cd   :  { %v6121_v58 = vpop.eup %6120  ;;  %v4740_v59 = vadd.f32 0.5, %v4732_v55  ;;  %v4733_v60 = vmul.f32 0.5, %v6119_v17 }
 0x6ce   :  { %v4742_v61 = vadd.f32 0.5, %v4734_v57  ;;  %v4735_v62 = vmul.f32 0.5, %v6121_v58 }
 0x6cf   :  { %v4741_v63 = vadd.f32 0.5, %v4733_v60 }
 0x6d0   :  { %v4743_v2 = vadd.f32 0.5, %v4735_v62 }
 0x6d1   :  { %v4756_v3 = vcombine.low %v4740_v59, %v4741_v63 }
 0x6d2   :  { %v6123_v5 = vpop.eup %6122  ;;  %v4757_v6 = vcombine.low %v4742_v61, %v4743_v2 }
 0x6d3   :  { %v6125_v7 = vpop.eup %6124  ;;  %v4766_v9 = vrot.slane %v4756_v3, %v4765_v1  ;;  %v4736_v10 = vmul.f32 0.5, %v6123_v5 }
 0x6d4   :  { %v6127_v11 = vpop.eup %6126  ;;  %v4773_v12 = vrot.slane %v4757_v6, %v4765_v1  ;;  %v4738_v0 = vmul.f32 0.5, %v6125_v7 }
 0x6d5   :  { %v6129_v13 = vpop.eup %6128  ;;  %v4744_v14 = vadd.f32 0.5, %v4736_v10  ;;  %v4737_v4 = vmul.f32 0.5, %v6127_v11 }
 0x6d6   :  { %v4788_v15 = vcombine.low %v4766_v9, %v4773_v12  ;;  %v4746_v16 = vadd.f32 0.5, %v4738_v0  ;;  %v4739_v18 = vmul.f32 0.5, %v6129_v13 }
 0x6d7   :  { %v4745_v19 = vadd.f32 0.5, %v4737_v4 }
 0x6d8   :  { %v4747_v21 = vadd.f32 0.5, %v4739_v18  ;;  %v4796_v26 = vrot.slane %v4788_v15, %v4765_v1 }
 0x6d9   :  { %v4758_v22 = vcombine.low %v4744_v14, %v4745_v19 }
 0x6da   :  { %v4759_v8 = vcombine.low %v4746_v16, %v4747_v21 }
 0x6db   :  { %v4780_v23 = vrot.slane %v4758_v22, %v4765_v1 }
 0x6dc   :  { %v4787_v24 = vrot.slane %v4759_v8, %v4765_v1 }
 0x6de   :  { %v4789_v25 = vcombine.low %v4780_v23, %v4787_v24 }
 0x6e0   :  { %v4803_v27 = vrot.slane %v4789_v25, %v4765_v1 }
 0x6e2   :  { %v4804_v28 = vcombine.low %v4796_v26, %v4803_v27 }
 0x6e4   :  { %4806 = vst [vmem:[%s7155_s3] sm:$0xff] %v4804_v28 }
 0x6e5   :  { %4811 = vsyncpa [#allocation5], 1 }

</bundles_post_ra>
